<compile_context>
chip_gen: v7x
topology: tpu7x:2x2x1
jax: 0.10.0
libtpu: 0.0.40
codegen_flags: <defaults>
</compile_context>

<pallas_src>
import functools

import jax
import jax.numpy as jnp
import numpy as np
from jax.experimental import pallas as pl
from jax.experimental.pallas import tpu as pltpu


def _round_up(x, m):
    return (x + m - 1) // m * m


def _sigmoid(x):
    # One EUP tanh + two VPU ops (cheaper than exp + add + divide).
    return 0.5 * jnp.tanh(0.5 * x) + 0.5


# ----------------------------------------------------------------------------
# Kernel: the WHOLE decode step (all layers + fc head) in one invocation.
# ----------------------------------------------------------------------------
def _decoder_kernel(x_ref, wx0_ref, wrec_ref, b_ref, h_in_ref, c_in_ref,
                    fc_w_ref, fc_b_ref, h_out_ref, c_out_ref, pred_ref,
                    xh_ref, *, layer_num, hp):
    f32 = jnp.float32
    wdt = wrec_ref.dtype

    h_t = None
    for l in range(layer_num):                     # static unroll (layer loop)
        h_prev = h_in_ref[l]                       # (bp, hp) f32
        c_prev = c_in_ref[l]                       # (bp, hp) f32

        if l == 0:
            # Layer 0: dedicated narrow (dp, 4*hp) input slab + the W_hh half
            # of the recurrent slab (no dead max(dp,hp) K rows).
            gates = jnp.dot(x_ref[...].astype(wdt), wx0_ref[...],
                            preferred_element_type=f32)
            gates = gates + jnp.dot(h_prev.astype(wdt),
                                    wrec_ref[0, hp:2 * hp, :],
                                    preferred_element_type=f32)
        else:
            # Layers >= 1: one fused [h_{l-1}, h_prev] @ W matmul through the
            # bf16 VMEM carry (no concatenate, no fresh buffer).
            xh_ref[:, hp:2 * hp] = h_prev.astype(wdt)
            gates = jnp.dot(xh_ref[...], wrec_ref[l],
                            preferred_element_type=f32)
        gates = gates + b_ref[l]                   # (bp, 4*hp) f32

        # PyTorch gate order: i, f, g, o (each gate padded to hp lanes).
        i_g = _sigmoid(gates[:, 0 * hp:1 * hp])
        f_g = _sigmoid(gates[:, 1 * hp:2 * hp])
        g_g = jnp.tanh(gates[:, 2 * hp:3 * hp])
        o_g = _sigmoid(gates[:, 3 * hp:4 * hp])

        c_t = f_g * c_prev + i_g * g_g             # f32 cell update
        h_t = o_g * jnp.tanh(c_t)

        h_out_ref[l] = h_t
        c_out_ref[l] = c_t

        if l + 1 < layer_num:
            # Hand h_t to the next layer (padded lanes of h_t are exactly 0).
            xh_ref[:, 0:hp] = h_t.astype(wdt)

    # Fused fc_out head: (bp, hp) x (hp, dp), lane-dense 128-multiple output.
    pred = jnp.dot(h_t.astype(fc_w_ref.dtype), fc_w_ref[...],
                   preferred_element_type=f32)
    pred_ref[...] = pred + fc_b_ref[...]


# ----------------------------------------------------------------------------
# Wrapper: pad -> single pallas_call -> unpad.
# ----------------------------------------------------------------------------
@jax.jit
def decoder_step(decoder_input, hidden, cell, packed):
    """Pallas forward of Decoder.forward: returns (prediction, hidden, cell)."""
    b, d = decoder_input.shape
    l_num, _, h = hidden.shape

    wx0 = packed["w_x0"]              # (dp, 4*hp)       bf16
    w_rec = packed["w_rec"]           # (L, 2*hp, 4*hp)  bf16
    b_all = packed["b_lstm"]          # (L, 1, 4*hp)     f32
    fc_w = packed["fc_w"]             # (hp, dp)         bf16
    fc_b = packed["fc_b"]             # (1, dp)          f32

    dp = wx0.shape[0]
    hp = w_rec.shape[1] // 2
    bp = _round_up(max(b, 8), 8)

    f32 = jnp.float32
    x_pad = jnp.zeros((bp, dp), f32).at[:b, :d].set(decoder_input.astype(f32))
    h_pad = jnp.zeros((l_num, bp, hp), f32).at[:, :b, :h].set(hidden.astype(f32))
    c_pad = jnp.zeros((l_num, bp, hp), f32).at[:, :b, :h].set(cell.astype(f32))

    kernel = functools.partial(_decoder_kernel, layer_num=l_num, hp=hp)

    inputs = (x_pad, wx0, w_rec, b_all, h_pad, c_pad, fc_w, fc_b)
    out_shape = (
        jax.ShapeDtypeStruct((l_num, bp, hp), f32),   # new hidden
        jax.ShapeDtypeStruct((l_num, bp, hp), f32),   # new cell
        jax.ShapeDtypeStruct((bp, dp), f32),          # prediction
    )

    # Resident VMEM footprint (single whole-array blocks, no double-buffering).
    resident = sum(int(np.prod(a.shape)) * a.dtype.itemsize for a in inputs)
    resident += sum(int(np.prod(s.shape)) * 4 for s in out_shape)
    resident += bp * 2 * hp * 2                       # bf16 carry scratch
    compiler_params = None
    if resident > 12 * 1024 * 1024:                   # raise scoped VMEM limit
        compiler_params = pltpu.CompilerParams(
            vmem_limit_bytes=min(int(resident * 1.5) + (4 << 20), 100 << 20))

    vmem = lambda: pl.BlockSpec(memory_space=pltpu.MemorySpace.VMEM)

    h_new, c_new, pred = pl.pallas_call(
        kernel,
        out_shape=out_shape,
        in_specs=[vmem() for _ in inputs],
        out_specs=tuple(vmem() for _ in out_shape),
        scratch_shapes=[pltpu.VMEM((bp, 2 * hp), w_rec.dtype)],  # [x_prev|h] carry
        # Update hidden/cell in place (inputs 4,5 -> outputs 0,1).
        input_output_aliases={4: 0, 5: 1},
        compiler_params=compiler_params,
    )(*inputs)

    return (pred[:b, :d], h_new[:, :b, :h], c_new[:, :b, :h])


# ----------------------------------------------------------------------------
# Parameter construction / packing (host side, done once).
# ----------------------------------------------------------------------------
def init_decoder_params(key, output_dim, hidden_dim, layer_num):
    """Random parameters in the PyTorch nn.LSTM / nn.Linear layout."""
    params = {}
    keys = jax.random.split(key, 2 * layer_num + 2)
    for l in range(layer_num):
        in_dim = output_dim if l == 0 else hidden_dim
        params[f"w_ih_{l}"] = jax.random.normal(
            keys[2 * l], (4 * hidden_dim, in_dim), jnp.float32
        ) * (2.0 / (in_dim + hidden_dim)) ** 0.5
        params[f"w_hh_{l}"] = jax.random.normal(
            keys[2 * l + 1], (4 * hidden_dim, hidden_dim), jnp.float32
        ) * (1.0 / hidden_dim ** 0.5)
        params[f"b_ih_{l}"] = jnp.zeros((4 * hidden_dim,), jnp.float32)
        params[f"b_hh_{l}"] = jnp.zeros((4 * hidden_dim,), jnp.float32)
    bound = 1.0 / hidden_dim ** 0.5
    params["fc_w"] = jax.random.uniform(
        keys[-2], (output_dim, hidden_dim), jnp.float32, -bound, bound)
    params["fc_b"] = jax.random.uniform(
        keys[-1], (output_dim,), jnp.float32, -bound, bound)
    return params


def pack_decoder_params(params, output_dim, hidden_dim, layer_num,
                        weight_dtype=jnp.bfloat16):
    """Pad + fuse parameters into MXU-friendly slabs.

    * w_x0   (dp, 4*hp):      layer-0 input projection W_ih_0^T (own slab, so
                              the recurrent slabs carry no dead K rows).
    * w_rec  (L, 2*hp, 4*hp): rows [0:hp] = W_ih_l^T (zeros for l == 0),
                              rows [hp:2hp] = W_hh_l^T; one fused [x, h] @ W
                              matmul produces all four (i, f, g, o) gates.
    * b_lstm (L, 1, 4*hp):    b_ih + b_hh, per gate, padded to hp lanes.
    All padding is zero (see PADDING INVARIANT at the top of the file).
    """
    d, h, l_num = output_dim, hidden_dim, layer_num
    dp = _round_up(d, 128)
    hp = _round_up(h, 128)

    w_x0 = np.zeros((dp, 4 * hp), np.float32)
    w_rec = np.zeros((l_num, 2 * hp, 4 * hp), np.float32)
    b_all = np.zeros((l_num, 1, 4 * hp), np.float32)
    for l in range(l_num):
        w_ih = np.asarray(params[f"w_ih_{l}"])    # (4H, in)
        w_hh = np.asarray(params[f"w_hh_{l}"])    # (4H, H)
        b_ih = np.asarray(params[f"b_ih_{l}"])
        b_hh = np.asarray(params[f"b_hh_{l}"])
        for g in range(4):                        # PyTorch gate order i, f, g, o
            rows = slice(g * h, (g + 1) * h)
            cols = slice(g * hp, g * hp + h)
            if l == 0:
                w_x0[0:d, cols] = w_ih[rows, :].T
            else:
                w_rec[l, 0:h, cols] = w_ih[rows, :].T
            w_rec[l, hp:hp + h, cols] = w_hh[rows, :].T
            b_all[l, 0, cols] = b_ih[rows] + b_hh[rows]

    fc_w = np.zeros((hp, dp), np.float32)
    fc_w[0:h, 0:d] = np.asarray(params["fc_w"]).T
    fc_b = np.zeros((1, dp), np.float32)
    fc_b[0, 0:d] = np.asarray(params["fc_b"])

    # TODO(synk): for v5e/v6e these slabs can be int8 (per-column scales folded
    # into the f32 bias); on v7x use fp8 or bf16 (no int MXU path).
    return {
        "w_x0": jnp.asarray(w_x0, weight_dtype),
        "w_rec": jnp.asarray(w_rec, weight_dtype),
        "b_lstm": jnp.asarray(b_all, jnp.float32),
        "fc_w": jnp.asarray(fc_w, weight_dtype),
        "fc_b": jnp.asarray(fc_b, jnp.float32),
    }


# ----------------------------------------------------------------------------
# Pure-JAX reference (PyTorch LSTM-cell semantics, same bf16 weight quant).
# ----------------------------------------------------------------------------
def decoder_reference(decoder_input, hidden, cell, params,
                      weight_dtype=jnp.bfloat16):
    def q(a):
        return a.astype(weight_dtype).astype(jnp.float32)

    def sig(x):
        return 1.0 / (1.0 + jnp.exp(-x))

    l_num = hidden.shape[0]
    x = decoder_input.astype(jnp.float32)
    h_new, c_new = [], []
    for l in range(l_num):
        gates = (q(x) @ q(params[f"w_ih_{l}"]).T
                 + q(hidden[l]) @ q(params[f"w_hh_{l}"]).T
                 + params[f"b_ih_{l}"] + params[f"b_hh_{l}"])
        i_g, f_g, g_g, o_g = jnp.split(gates, 4, axis=-1)
        i_g, f_g, o_g = sig(i_g), sig(f_g), sig(o_g)
        g_g = jnp.tanh(g_g)
        c_t = f_g * cell[l] + i_g * g_g
        h_t = o_g * jnp.tanh(c_t)
        h_new.append(h_t)
        c_new.append(c_t)
        x = h_t
    pred = q(x) @ q(params["fc_w"]).T + params["fc_b"]
    return pred, jnp.stack(h_new), jnp.stack(c_new)


if __name__ == "__main__":
    batch, output_dim, hidden_dim, layer_num = 2, 4, 32, 3

    key = jax.random.PRNGKey(0)
    k_par, k_x, k_h, k_c = jax.random.split(key, 4)

    params = init_decoder_params(k_par, output_dim, hidden_dim, layer_num)
    packed = pack_decoder_params(params, output_dim, hidden_dim, layer_num)

    decoder_input = jax.random.normal(k_x, (batch, output_dim), jnp.float32)
    hidden = jax.random.normal(k_h, (layer_num, batch, hidden_dim), jnp.float32)
    cell = jax.random.normal(k_c, (layer_num, batch, hidden_dim), jnp.float32)

    pred, h_new, c_new = decoder_step(decoder_input, hidden, cell, packed)
    jax.block_until_ready((pred, h_new, c_new))

    # Sanity check against a pure-JAX reference using the same bf16 weights.
    pred_r, h_r, c_r = decoder_reference(decoder_input, hidden, cell, params)
    np.testing.assert_allclose(np.asarray(pred), np.asarray(pred_r),
                               atol=2e-2, rtol=2e-2)
    np.testing.assert_allclose(np.asarray(h_new), np.asarray(h_r),
                               atol=2e-2, rtol=2e-2)
    np.testing.assert_allclose(np.asarray(c_new), np.asarray(c_r),
                               atol=2e-2, rtol=2e-2)

    print("KERNEL_OK")
</pallas_src>

<mosaic_0001>
module attributes {stable_mosaic.version = 11 : i64} {
  func.func @_decoder_kernel(%arg0: memref<8x128xf32, #tpu.memory_space<vmem>>, %arg1: memref<128x512xbf16, #tpu.memory_space<vmem>>, %arg2: memref<3x256x512xbf16, #tpu.memory_space<vmem>>, %arg3: memref<3x1x512xf32, #tpu.memory_space<vmem>>, %arg4: memref<3x8x128xf32, #tpu.memory_space<vmem>>, %arg5: memref<3x8x128xf32, #tpu.memory_space<vmem>>, %arg6: memref<128x128xbf16, #tpu.memory_space<vmem>>, %arg7: memref<1x128xf32, #tpu.memory_space<vmem>>, %arg8: memref<3x8x128xf32, #tpu.memory_space<vmem>>, %arg9: memref<3x8x128xf32, #tpu.memory_space<vmem>>, %arg10: memref<8x128xf32, #tpu.memory_space<vmem>>, %arg11: memref<8x256xbf16, #tpu.memory_space<vmem>>) attributes {dimension_semantics = [], scalar_prefetch = 0 : i64, scratch_operands = 1 : i64, tpu.core_type = #tpu.core_type<tc>} {
    %c0 = arith.constant 0 : index
    %c0_0 = arith.constant 0 : index
    %c0_1 = arith.constant 0 : index
    %0 = vector.load %arg4[%c0, %c0_0, %c0_1] : memref<3x8x128xf32, #tpu.memory_space<vmem>>, vector<1x8x128xf32>
    %1 = vector.shape_cast %0 : vector<1x8x128xf32> to vector<8x128xf32>
    %c0_2 = arith.constant 0 : index
    %c0_3 = arith.constant 0 : index
    %c0_4 = arith.constant 0 : index
    %2 = vector.load %arg5[%c0_2, %c0_3, %c0_4] : memref<3x8x128xf32, #tpu.memory_space<vmem>>, vector<1x8x128xf32>
    %3 = vector.shape_cast %2 : vector<1x8x128xf32> to vector<8x128xf32>
    %c0_5 = arith.constant 0 : index
    %c0_6 = arith.constant 0 : index
    %4 = vector.load %arg0[%c0_5, %c0_6] : memref<8x128xf32, #tpu.memory_space<vmem>>, vector<8x128xf32>
    %5 = arith.truncf %4 : vector<8x128xf32> to vector<8x128xbf16>
    %c0_7 = arith.constant 0 : index
    %c0_8 = arith.constant 0 : index
    %6 = vector.load %arg1[%c0_7, %c0_8] : memref<128x512xbf16, #tpu.memory_space<vmem>>, vector<128x512xbf16>
    %cst = arith.constant dense<0.000000e+00> : vector<8x512xf32>
    %7 = tpu.matmul %5, %6, %cst {dimension_numbers = #tpu.dot_dimension_numbers<[1], [0], [0], [1], [0, 0, 1, 1], [], []>} : vector<8x128xbf16>, vector<128x512xbf16>, vector<8x512xf32> -> vector<8x512xf32>
    %8 = arith.truncf %1 : vector<8x128xf32> to vector<8x128xbf16>
    %c0_9 = arith.constant 0 : index
    %c128 = arith.constant 128 : index
    %c0_10 = arith.constant 0 : index
    %9 = vector.load %arg2[%c0_9, %c128, %c0_10] : memref<3x256x512xbf16, #tpu.memory_space<vmem>>, vector<1x128x512xbf16>
    %10 = vector.shape_cast %9 : vector<1x128x512xbf16> to vector<128x512xbf16>
    %cst_11 = arith.constant dense<0.000000e+00> : vector<8x512xf32>
    %11 = tpu.matmul %8, %10, %cst_11 {dimension_numbers = #tpu.dot_dimension_numbers<[1], [0], [0], [1], [0, 0, 1, 1], [], []>} : vector<8x128xbf16>, vector<128x512xbf16>, vector<8x512xf32> -> vector<8x512xf32>
    %12 = arith.addf %7, %11 : vector<8x512xf32>
    %c0_12 = arith.constant 0 : index
    %c0_13 = arith.constant 0 : index
    %c0_14 = arith.constant 0 : index
    %13 = vector.load %arg3[%c0_12, %c0_13, %c0_14] : memref<3x1x512xf32, #tpu.memory_space<vmem>>, vector<1x1x512xf32>
    %14 = vector.shape_cast %13 : vector<1x1x512xf32> to vector<1x512xf32>
    %15 = vector.broadcast %14 : vector<1x512xf32> to vector<8x512xf32>
    %16 = arith.addf %12, %15 : vector<8x512xf32>
    %17 = vector.extract_strided_slice %16 {offsets = [0, 0], sizes = [8, 128], strides = [1, 1]} : vector<8x512xf32> to vector<8x128xf32>
    %cst_15 = arith.constant 5.000000e-01 : f32
    %18 = vector.broadcast %cst_15 : f32 to vector<8x128xf32>
    %19 = arith.mulf %18, %17 : vector<8x128xf32>
    %20 = math.tanh %19 : vector<8x128xf32>
    %cst_16 = arith.constant 5.000000e-01 : f32
    %21 = vector.broadcast %cst_16 : f32 to vector<8x128xf32>
    %22 = arith.mulf %21, %20 : vector<8x128xf32>
    %cst_17 = arith.constant 5.000000e-01 : f32
    %23 = vector.broadcast %cst_17 : f32 to vector<8x128xf32>
    %24 = arith.addf %22, %23 : vector<8x128xf32>
    %25 = vector.extract_strided_slice %16 {offsets = [0, 128], sizes = [8, 128], strides = [1, 1]} : vector<8x512xf32> to vector<8x128xf32>
    %cst_18 = arith.constant 5.000000e-01 : f32
    %26 = vector.broadcast %cst_18 : f32 to vector<8x128xf32>
    %27 = arith.mulf %26, %25 : vector<8x128xf32>
    %28 = math.tanh %27 : vector<8x128xf32>
    %cst_19 = arith.constant 5.000000e-01 : f32
    %29 = vector.broadcast %cst_19 : f32 to vector<8x128xf32>
    %30 = arith.mulf %29, %28 : vector<8x128xf32>
    %cst_20 = arith.constant 5.000000e-01 : f32
    %31 = vector.broadcast %cst_20 : f32 to vector<8x128xf32>
    %32 = arith.addf %30, %31 : vector<8x128xf32>
    %33 = vector.extract_strided_slice %16 {offsets = [0, 256], sizes = [8, 128], strides = [1, 1]} : vector<8x512xf32> to vector<8x128xf32>
    %34 = math.tanh %33 : vector<8x128xf32>
    %35 = vector.extract_strided_slice %16 {offsets = [0, 384], sizes = [8, 128], strides = [1, 1]} : vector<8x512xf32> to vector<8x128xf32>
    %cst_21 = arith.constant 5.000000e-01 : f32
    %36 = vector.broadcast %cst_21 : f32 to vector<8x128xf32>
    %37 = arith.mulf %36, %35 : vector<8x128xf32>
    %38 = math.tanh %37 : vector<8x128xf32>
    %cst_22 = arith.constant 5.000000e-01 : f32
    %39 = vector.broadcast %cst_22 : f32 to vector<8x128xf32>
    %40 = arith.mulf %39, %38 : vector<8x128xf32>
    %cst_23 = arith.constant 5.000000e-01 : f32
    %41 = vector.broadcast %cst_23 : f32 to vector<8x128xf32>
    %42 = arith.addf %40, %41 : vector<8x128xf32>
    %43 = arith.mulf %32, %3 : vector<8x128xf32>
    %44 = arith.mulf %24, %34 : vector<8x128xf32>
    %45 = arith.addf %43, %44 : vector<8x128xf32>
    %46 = math.tanh %45 : vector<8x128xf32>
    %47 = arith.mulf %42, %46 : vector<8x128xf32>
    %c0_24 = arith.constant 0 : index
    %c0_25 = arith.constant 0 : index
    %c0_26 = arith.constant 0 : index
    %48 = vector.load %arg8[%c0_24, %c0_25, %c0_26] : memref<3x8x128xf32, #tpu.memory_space<vmem>>, vector<1x8x128xf32>
    %49 = vector.shape_cast %48 : vector<1x8x128xf32> to vector<8x128xf32>
    %50 = vector.shape_cast %47 : vector<8x128xf32> to vector<1x8x128xf32>
    tpu.vector_store %arg8[%c0_24, %c0_25, %c0_26], %50 {strides = array<i32>} : memref<3x8x128xf32, #tpu.memory_space<vmem>>, vector<1x8x128xf32>,
    %c0_27 = arith.constant 0 : index
    %c0_28 = arith.constant 0 : index
    %c0_29 = arith.constant 0 : index
    %51 = vector.load %arg9[%c0_27, %c0_28, %c0_29] : memref<3x8x128xf32, #tpu.memory_space<vmem>>, vector<1x8x128xf32>
    %52 = vector.shape_cast %51 : vector<1x8x128xf32> to vector<8x128xf32>
    %53 = vector.shape_cast %45 : vector<8x128xf32> to vector<1x8x128xf32>
    tpu.vector_store %arg9[%c0_27, %c0_28, %c0_29], %53 {strides = array<i32>} : memref<3x8x128xf32, #tpu.memory_space<vmem>>, vector<1x8x128xf32>,
    %54 = arith.truncf %47 : vector<8x128xf32> to vector<8x128xbf16>
    %c0_30 = arith.constant 0 : index
    %c0_31 = arith.constant 0 : index
    %55 = vector.load %arg11[%c0_30, %c0_31] : memref<8x256xbf16, #tpu.memory_space<vmem>>, vector<8x128xbf16>
    tpu.vector_store %arg11[%c0_30, %c0_31], %54 {strides = array<i32>} : memref<8x256xbf16, #tpu.memory_space<vmem>>, vector<8x128xbf16>,
    %c1 = arith.constant 1 : index
    %c0_32 = arith.constant 0 : index
    %c0_33 = arith.constant 0 : index
    %56 = vector.load %arg4[%c1, %c0_32, %c0_33] : memref<3x8x128xf32, #tpu.memory_space<vmem>>, vector<1x8x128xf32>
    %57 = vector.shape_cast %56 : vector<1x8x128xf32> to vector<8x128xf32>
    %c1_34 = arith.constant 1 : index
    %c0_35 = arith.constant 0 : index
    %c0_36 = arith.constant 0 : index
    %58 = vector.load %arg5[%c1_34, %c0_35, %c0_36] : memref<3x8x128xf32, #tpu.memory_space<vmem>>, vector<1x8x128xf32>
    %59 = vector.shape_cast %58 : vector<1x8x128xf32> to vector<8x128xf32>
    %60 = arith.truncf %57 : vector<8x128xf32> to vector<8x128xbf16>
    %c0_37 = arith.constant 0 : index
    %c128_38 = arith.constant 128 : index
    %61 = vector.load %arg11[%c0_37, %c128_38] : memref<8x256xbf16, #tpu.memory_space<vmem>>, vector<8x128xbf16>
    tpu.vector_store %arg11[%c0_37, %c128_38], %60 {strides = array<i32>} : memref<8x256xbf16, #tpu.memory_space<vmem>>, vector<8x128xbf16>,
    %c0_39 = arith.constant 0 : index
    %c0_40 = arith.constant 0 : index
    %62 = vector.load %arg11[%c0_39, %c0_40] : memref<8x256xbf16, #tpu.memory_space<vmem>>, vector<8x256xbf16>
    %c1_41 = arith.constant 1 : index
    %c0_42 = arith.constant 0 : index
    %c0_43 = arith.constant 0 : index
    %63 = vector.load %arg2[%c1_41, %c0_42, %c0_43] : memref<3x256x512xbf16, #tpu.memory_space<vmem>>, vector<1x256x512xbf16>
    %64 = vector.shape_cast %63 : vector<1x256x512xbf16> to vector<256x512xbf16>
    %cst_44 = arith.constant dense<0.000000e+00> : vector<8x512xf32>
    %65 = tpu.matmul %62, %64, %cst_44 {dimension_numbers = #tpu.dot_dimension_numbers<[1], [0], [0], [1], [0, 0, 1, 1], [], []>} : vector<8x256xbf16>, vector<256x512xbf16>, vector<8x512xf32> -> vector<8x512xf32>
    %c1_45 = arith.constant 1 : index
    %c0_46 = arith.constant 0 : index
    %c0_47 = arith.constant 0 : index
    %66 = vector.load %arg3[%c1_45, %c0_46, %c0_47] : memref<3x1x512xf32, #tpu.memory_space<vmem>>, vector<1x1x512xf32>
    %67 = vector.shape_cast %66 : vector<1x1x512xf32> to vector<1x512xf32>
    %68 = vector.broadcast %67 : vector<1x512xf32> to vector<8x512xf32>
    %69 = arith.addf %65, %68 : vector<8x512xf32>
    %70 = vector.extract_strided_slice %69 {offsets = [0, 0], sizes = [8, 128], strides = [1, 1]} : vector<8x512xf32> to vector<8x128xf32>
    %cst_48 = arith.constant 5.000000e-01 : f32
    %71 = vector.broadcast %cst_48 : f32 to vector<8x128xf32>
    %72 = arith.mulf %71, %70 : vector<8x128xf32>
    %73 = math.tanh %72 : vector<8x128xf32>
    %cst_49 = arith.constant 5.000000e-01 : f32
    %74 = vector.broadcast %cst_49 : f32 to vector<8x128xf32>
    %75 = arith.mulf %74, %73 : vector<8x128xf32>
    %cst_50 = arith.constant 5.000000e-01 : f32
    %76 = vector.broadcast %cst_50 : f32 to vector<8x128xf32>
    %77 = arith.addf %75, %76 : vector<8x128xf32>
    %78 = vector.extract_strided_slice %69 {offsets = [0, 128], sizes = [8, 128], strides = [1, 1]} : vector<8x512xf32> to vector<8x128xf32>
    %cst_51 = arith.constant 5.000000e-01 : f32
    %79 = vector.broadcast %cst_51 : f32 to vector<8x128xf32>
    %80 = arith.mulf %79, %78 : vector<8x128xf32>
    %81 = math.tanh %80 : vector<8x128xf32>
    %cst_52 = arith.constant 5.000000e-01 : f32
    %82 = vector.broadcast %cst_52 : f32 to vector<8x128xf32>
    %83 = arith.mulf %82, %81 : vector<8x128xf32>
    %cst_53 = arith.constant 5.000000e-01 : f32
    %84 = vector.broadcast %cst_53 : f32 to vector<8x128xf32>
    %85 = arith.addf %83, %84 : vector<8x128xf32>
    %86 = vector.extract_strided_slice %69 {offsets = [0, 256], sizes = [8, 128], strides = [1, 1]} : vector<8x512xf32> to vector<8x128xf32>
    %87 = math.tanh %86 : vector<8x128xf32>
    %88 = vector.extract_strided_slice %69 {offsets = [0, 384], sizes = [8, 128], strides = [1, 1]} : vector<8x512xf32> to vector<8x128xf32>
    %cst_54 = arith.constant 5.000000e-01 : f32
    %89 = vector.broadcast %cst_54 : f32 to vector<8x128xf32>
    %90 = arith.mulf %89, %88 : vector<8x128xf32>
    %91 = math.tanh %90 : vector<8x128xf32>
    %cst_55 = arith.constant 5.000000e-01 : f32
    %92 = vector.broadcast %cst_55 : f32 to vector<8x128xf32>
    %93 = arith.mulf %92, %91 : vector<8x128xf32>
    %cst_56 = arith.constant 5.000000e-01 : f32
    %94 = vector.broadcast %cst_56 : f32 to vector<8x128xf32>
    %95 = arith.addf %93, %94 : vector<8x128xf32>
    %96 = arith.mulf %85, %59 : vector<8x128xf32>
    %97 = arith.mulf %77, %87 : vector<8x128xf32>
    %98 = arith.addf %96, %97 : vector<8x128xf32>
    %99 = math.tanh %98 : vector<8x128xf32>
    %100 = arith.mulf %95, %99 : vector<8x128xf32>
    %c1_57 = arith.constant 1 : index
    %c0_58 = arith.constant 0 : index
    %c0_59 = arith.constant 0 : index
    %101 = vector.load %arg8[%c1_57, %c0_58, %c0_59] : memref<3x8x128xf32, #tpu.memory_space<vmem>>, vector<1x8x128xf32>
    %102 = vector.shape_cast %101 : vector<1x8x128xf32> to vector<8x128xf32>
    %103 = vector.shape_cast %100 : vector<8x128xf32> to vector<1x8x128xf32>
    tpu.vector_store %arg8[%c1_57, %c0_58, %c0_59], %103 {strides = array<i32>} : memref<3x8x128xf32, #tpu.memory_space<vmem>>, vector<1x8x128xf32>,
    %c1_60 = arith.constant 1 : index
    %c0_61 = arith.constant 0 : index
    %c0_62 = arith.constant 0 : index
    %104 = vector.load %arg9[%c1_60, %c0_61, %c0_62] : memref<3x8x128xf32, #tpu.memory_space<vmem>>, vector<1x8x128xf32>
    %105 = vector.shape_cast %104 : vector<1x8x128xf32> to vector<8x128xf32>
    %106 = vector.shape_cast %98 : vector<8x128xf32> to vector<1x8x128xf32>
    tpu.vector_store %arg9[%c1_60, %c0_61, %c0_62], %106 {strides = array<i32>} : memref<3x8x128xf32, #tpu.memory_space<vmem>>, vector<1x8x128xf32>,
    %107 = arith.truncf %100 : vector<8x128xf32> to vector<8x128xbf16>
    %c0_63 = arith.constant 0 : index
    %c0_64 = arith.constant 0 : index
    %108 = vector.load %arg11[%c0_63, %c0_64] : memref<8x256xbf16, #tpu.memory_space<vmem>>, vector<8x128xbf16>
    tpu.vector_store %arg11[%c0_63, %c0_64], %107 {strides = array<i32>} : memref<8x256xbf16, #tpu.memory_space<vmem>>, vector<8x128xbf16>,
    %c2 = arith.constant 2 : index
    %c0_65 = arith.constant 0 : index
    %c0_66 = arith.constant 0 : index
    %109 = vector.load %arg4[%c2, %c0_65, %c0_66] : memref<3x8x128xf32, #tpu.memory_space<vmem>>, vector<1x8x128xf32>
    %110 = vector.shape_cast %109 : vector<1x8x128xf32> to vector<8x128xf32>
    %c2_67 = arith.constant 2 : index
    %c0_68 = arith.constant 0 : index
    %c0_69 = arith.constant 0 : index
    %111 = vector.load %arg5[%c2_67, %c0_68, %c0_69] : memref<3x8x128xf32, #tpu.memory_space<vmem>>, vector<1x8x128xf32>
    %112 = vector.shape_cast %111 : vector<1x8x128xf32> to vector<8x128xf32>
    %113 = arith.truncf %110 : vector<8x128xf32> to vector<8x128xbf16>
    %c0_70 = arith.constant 0 : index
    %c128_71 = arith.constant 128 : index
    %114 = vector.load %arg11[%c0_70, %c128_71] : memref<8x256xbf16, #tpu.memory_space<vmem>>, vector<8x128xbf16>
    tpu.vector_store %arg11[%c0_70, %c128_71], %113 {strides = array<i32>} : memref<8x256xbf16, #tpu.memory_space<vmem>>, vector<8x128xbf16>,
    %c0_72 = arith.constant 0 : index
    %c0_73 = arith.constant 0 : index
    %115 = vector.load %arg11[%c0_72, %c0_73] : memref<8x256xbf16, #tpu.memory_space<vmem>>, vector<8x256xbf16>
    %c2_74 = arith.constant 2 : index
    %c0_75 = arith.constant 0 : index
    %c0_76 = arith.constant 0 : index
    %116 = vector.load %arg2[%c2_74, %c0_75, %c0_76] : memref<3x256x512xbf16, #tpu.memory_space<vmem>>, vector<1x256x512xbf16>
    %117 = vector.shape_cast %116 : vector<1x256x512xbf16> to vector<256x512xbf16>
    %cst_77 = arith.constant dense<0.000000e+00> : vector<8x512xf32>
    %118 = tpu.matmul %115, %117, %cst_77 {dimension_numbers = #tpu.dot_dimension_numbers<[1], [0], [0], [1], [0, 0, 1, 1], [], []>} : vector<8x256xbf16>, vector<256x512xbf16>, vector<8x512xf32> -> vector<8x512xf32>
    %c2_78 = arith.constant 2 : index
    %c0_79 = arith.constant 0 : index
    %c0_80 = arith.constant 0 : index
    %119 = vector.load %arg3[%c2_78, %c0_79, %c0_80] : memref<3x1x512xf32, #tpu.memory_space<vmem>>, vector<1x1x512xf32>
    %120 = vector.shape_cast %119 : vector<1x1x512xf32> to vector<1x512xf32>
    %121 = vector.broadcast %120 : vector<1x512xf32> to vector<8x512xf32>
    %122 = arith.addf %118, %121 : vector<8x512xf32>
    %123 = vector.extract_strided_slice %122 {offsets = [0, 0], sizes = [8, 128], strides = [1, 1]} : vector<8x512xf32> to vector<8x128xf32>
    %cst_81 = arith.constant 5.000000e-01 : f32
    %124 = vector.broadcast %cst_81 : f32 to vector<8x128xf32>
    %125 = arith.mulf %124, %123 : vector<8x128xf32>
    %126 = math.tanh %125 : vector<8x128xf32>
    %cst_82 = arith.constant 5.000000e-01 : f32
    %127 = vector.broadcast %cst_82 : f32 to vector<8x128xf32>
    %128 = arith.mulf %127, %126 : vector<8x128xf32>
    %cst_83 = arith.constant 5.000000e-01 : f32
    %129 = vector.broadcast %cst_83 : f32 to vector<8x128xf32>
    %130 = arith.addf %128, %129 : vector<8x128xf32>
    %131 = vector.extract_strided_slice %122 {offsets = [0, 128], sizes = [8, 128], strides = [1, 1]} : vector<8x512xf32> to vector<8x128xf32>
    %cst_84 = arith.constant 5.000000e-01 : f32
    %132 = vector.broadcast %cst_84 : f32 to vector<8x128xf32>
    %133 = arith.mulf %132, %131 : vector<8x128xf32>
    %134 = math.tanh %133 : vector<8x128xf32>
    %cst_85 = arith.constant 5.000000e-01 : f32
    %135 = vector.broadcast %cst_85 : f32 to vector<8x128xf32>
    %136 = arith.mulf %135, %134 : vector<8x128xf32>
    %cst_86 = arith.constant 5.000000e-01 : f32
    %137 = vector.broadcast %cst_86 : f32 to vector<8x128xf32>
    %138 = arith.addf %136, %137 : vector<8x128xf32>
    %139 = vector.extract_strided_slice %122 {offsets = [0, 256], sizes = [8, 128], strides = [1, 1]} : vector<8x512xf32> to vector<8x128xf32>
    %140 = math.tanh %139 : vector<8x128xf32>
    %141 = vector.extract_strided_slice %122 {offsets = [0, 384], sizes = [8, 128], strides = [1, 1]} : vector<8x512xf32> to vector<8x128xf32>
    %cst_87 = arith.constant 5.000000e-01 : f32
    %142 = vector.broadcast %cst_87 : f32 to vector<8x128xf32>
    %143 = arith.mulf %142, %141 : vector<8x128xf32>
    %144 = math.tanh %143 : vector<8x128xf32>
    %cst_88 = arith.constant 5.000000e-01 : f32
    %145 = vector.broadcast %cst_88 : f32 to vector<8x128xf32>
    %146 = arith.mulf %145, %144 : vector<8x128xf32>
    %cst_89 = arith.constant 5.000000e-01 : f32
    %147 = vector.broadcast %cst_89 : f32 to vector<8x128xf32>
    %148 = arith.addf %146, %147 : vector<8x128xf32>
    %149 = arith.mulf %138, %112 : vector<8x128xf32>
    %150 = arith.mulf %130, %140 : vector<8x128xf32>
    %151 = arith.addf %149, %150 : vector<8x128xf32>
    %152 = math.tanh %151 : vector<8x128xf32>
    %153 = arith.mulf %148, %152 : vector<8x128xf32>
    %c2_90 = arith.constant 2 : index
    %c0_91 = arith.constant 0 : index
    %c0_92 = arith.constant 0 : index
    %154 = vector.load %arg8[%c2_90, %c0_91, %c0_92] : memref<3x8x128xf32, #tpu.memory_space<vmem>>, vector<1x8x128xf32>
    %155 = vector.shape_cast %154 : vector<1x8x128xf32> to vector<8x128xf32>
    %156 = vector.shape_cast %153 : vector<8x128xf32> to vector<1x8x128xf32>
    tpu.vector_store %arg8[%c2_90, %c0_91, %c0_92], %156 {strides = array<i32>} : memref<3x8x128xf32, #tpu.memory_space<vmem>>, vector<1x8x128xf32>,
    %c2_93 = arith.constant 2 : index
    %c0_94 = arith.constant 0 : index
    %c0_95 = arith.constant 0 : index
    %157 = vector.load %arg9[%c2_93, %c0_94, %c0_95] : memref<3x8x128xf32, #tpu.memory_space<vmem>>, vector<1x8x128xf32>
    %158 = vector.shape_cast %157 : vector<1x8x128xf32> to vector<8x128xf32>
    %159 = vector.shape_cast %151 : vector<8x128xf32> to vector<1x8x128xf32>
    tpu.vector_store %arg9[%c2_93, %c0_94, %c0_95], %159 {strides = array<i32>} : memref<3x8x128xf32, #tpu.memory_space<vmem>>, vector<1x8x128xf32>,
    %160 = arith.truncf %153 : vector<8x128xf32> to vector<8x128xbf16>
    %c0_96 = arith.constant 0 : index
    %c0_97 = arith.constant 0 : index
    %161 = vector.load %arg6[%c0_96, %c0_97] : memref<128x128xbf16, #tpu.memory_space<vmem>>, vector<128x128xbf16>
    %cst_98 = arith.constant dense<0.000000e+00> : vector<8x128xf32>
    %162 = tpu.matmul %160, %161, %cst_98 {dimension_numbers = #tpu.dot_dimension_numbers<[1], [0], [0], [1], [0, 0, 1, 1], [], []>} : vector<8x128xbf16>, vector<128x128xbf16>, vector<8x128xf32> -> vector<8x128xf32>
    %c0_99 = arith.constant 0 : index
    %c0_100 = arith.constant 0 : index
    %163 = vector.load %arg7[%c0_99, %c0_100] : memref<1x128xf32, #tpu.memory_space<vmem>>, vector<1x128xf32>
    %164 = vector.broadcast %163 : vector<1x128xf32> to vector<8x128xf32>
    %165 = arith.addf %162, %164 : vector<8x128xf32>
    %c0_101 = arith.constant 0 : index
    %c0_102 = arith.constant 0 : index
    %166 = vector.load %arg10[%c0_101, %c0_102] : memref<8x128xf32, #tpu.memory_space<vmem>>, vector<8x128xf32>
    tpu.vector_store %arg10[%c0_101, %c0_102], %165 {strides = array<i32>} : memref<8x128xf32, #tpu.memory_space<vmem>>, vector<8x128xf32>,
    return
  }
}

</mosaic_0001>

<bundles_post_ra>
// kernel: decoder_step.1
= control target key start
LH: loop header
LB: loop body
LE: loop exit
PB: predicated region body
PF: predicated region fallthrough
CT: control target
= control target key end

     0   :  { %16 = vsyncpa [#allocation4], 0  ;;  %s2670_s0 = inlined_call_operand.vmem [shape: f32[8,128], index: 0, kind: input, shape index: {}]   ;;  %s2671_s1 = inlined_call_operand.hbm [shape: bf16[128,512], index: 1, kind: input, shape index: {}]   ;;  %s2672_s2 = inlined_call_operand.hbm [shape: bf16[3,256,512], index: 2, kind: input, shape index: {}]   ;;  %s2673_s3 = inlined_call_operand.vmem [shape: f32[3,1,512], index: 3, kind: input, shape index: {}]   ;;  %s2674_s4 = inlined_call_operand.vmem [shape: f32[3,8,128], index: 4, kind: input, shape index: {}, may-alias: {4,8}]   ;;  %s2675_s5 = inlined_call_operand.vmem [shape: f32[3,8,128], index: 5, kind: input, shape index: {}, may-alias: {5,9}]   ;;  %s2676_s6 = inlined_call_operand.vmem [shape: bf16[128,128], index: 6, kind: input, shape index: {}]   ;;  %s2677_s7 = inlined_call_operand.vmem [shape: f32[1,128], index: 7, kind: input, shape index: {}]   ;;  %s2678_s8 = inlined_call_operand.vmem [shape: f32[3,8,128], index: 8, kind: output, shape index: {0}, may-alias: {4,8}]   ;;  %s2679_s9 = inlined_call_operand.vmem [shape: f32[3,8,128], index: 9, kind: output, shape index: {1}, may-alias: {5,9}]   ;;  %s2680_s10 = inlined_call_operand.vmem [shape: f32[8,128], index: 10, kind: output, shape index: {2}]  }
   0x1   :  { %17 = vsyncpa [#allocation6], 0  ;;  %s2482_s13 = smov [#allocation3]   ;;  %s2434_s17 = scalar_lea.hbm %s2671_s1, 4096 }
   0x2   :  { %s25_s14 = sshll.u32 %s2482_s13, 4  ;;  %p2435_p0 = scmp.ne.s32.totalorder %s2671_s1, %s2434_s17  ;;  %s26_s14 = int_to_ptr.vmem [resolvable:$true] %s25_s14 }
   0x3   :  { %p2438_p1 = scmp.lt.u32.totalorder %s2434_s17, %s2671_s1 }
   0x5   :  { %p2440_p2 = pnand %p2438_p1, %p2435_p0 }
   0x7   :  { %2443 = shalt.err (!%p2440_p2)
}
   0x8   :  { %s2444_s22 = scalar_lea.vmem %s26_s14, 4096  ;;  %p2449_p4 = scmp.lt.s32.totalorder %s26_s14, %s26_s14 }
   0x9   :  { %p2445_p3 = scmp.ne.s32.totalorder %s26_s14, %s2444_s22  ;;  %p2450_p5 = scmp.lt.s32.totalorder %s2444_s22, %s2444_s22 }
   0xb   :  { %p2451_p6 = por %p2450_p5, %p2449_p4 }
   0xd   :  { %p2452_p7 = pnand %p2451_p6, %p2445_p3 }
   0xf   :  { %2455 = shalt.err (!%p2452_p7)
}
  0x10   :  { %s2483_s23 = smov 256   ;;  %s2484_s24 = smov 16  }
  0x11   :  { %31 = dma.hbm_to_vmem [thread:$0]  %s2671_s1, 4096, %s26_s14, [#allocation4], %s2483_s23, %s2483_s23, %s2484_s24  }
  0x12   :  { %s2485_s27 = smov [#allocation5]   ;;  %s2456_s11 = scalar_lea.hbm %s2672_s2, 24576 }
  0x13   :  { %s37_s28 = sshll.u32 %s2485_s27, 4  ;;  %p2457_p8 = scmp.ne.s32.totalorder %s2672_s2, %s2456_s11  ;;  %s38_s28 = int_to_ptr.vmem [resolvable:$true] %s37_s28 }
  0x14   :  { %p2460_p9 = scmp.lt.u32.totalorder %s2456_s11, %s2672_s2 }
  0x16   :  { %p2462_p10 = pnand %p2460_p9, %p2457_p8 }
  0x18   :  { %2465 = shalt.err (!%p2462_p10)
}
  0x19   :  { %s2466_s17 = scalar_lea.vmem %s38_s28, 24576  ;;  %p2471_p12 = scmp.lt.s32.totalorder %s38_s28, %s38_s28 }
  0x1a   :  { %p2467_p11 = scmp.ne.s32.totalorder %s38_s28, %s2466_s17  ;;  %p2472_p13 = scmp.lt.s32.totalorder %s2466_s17, %s2466_s17 }
  0x1c   :  { %p2473_p0 = por %p2472_p13, %p2471_p12 }
  0x1e   :  { %p2474_p1 = pnand %p2473_p0, %p2467_p11 }
  0x20   :  { %2477 = shalt.err (!%p2474_p1)
}
  0x21   :  { %43 = dma.hbm_to_vmem [thread:$0]  %s2672_s2, 24576, %s38_s28, [#allocation6], %s2483_s23, %s2483_s23, %s2484_s24  }
  0x22   :  { %2478 = dma.done.wait [#allocation4], 4096  }
  0x23   :  { %2479 = vsyncadd [#allocation4], 4294963200 }
  0x24   :  { %2480 = dma.done.wait [#allocation6], 24576  }
  0x25   :  { %2481 = vsyncadd [#allocation6], 4294942720  ;;  %v2486_v0 = vmov 0   ;;  %v2108_v1 = vld [vmem:[#allocation5 + $0x104] ss:$16 sps:$4 sm:$0xff]   ;;  %vm2488_vm0 = vmmov 0  }
  0x26   :  { %322 = vmatprep.mubr.bf16.mxu0 %v2486_v0  ;;  %363 = vmatprep.mubr.bf16.mxu1 %v2486_v0  ;;  %v2110_v2 = vld [vmem:[#allocation5 + $0x10c] ss:$16 sps:$4 sm:$0xff]   ;;  %v2112_v3 = vld [vmem:[#allocation5 + $0x100] ss:$16 sps:$4 sm:$0xff]   ;;  %v2113_v4 = vld [vmem:[#allocation5 + $0x108] ss:$16 sps:$4 sm:$0xff]  }
  0x27   :  { %290 = vmatprep.subr.bf16.mxu0 %v2108_v1  ;;  %331 = vmatprep.subr.bf16.mxu1 %v2110_v2  ;;  %v2114_v5 = vld [vmem:[#allocation5 + $0x124] ss:$16 sps:$4 sm:$0xff]   ;;  %v2116_v6 = vld [vmem:[#allocation5 + $0x12c] ss:$16 sps:$4 sm:$0xff]   ;;  %v2118_v7 = vld [vmem:[#allocation5 + $0x120] ss:$16 sps:$4 sm:$0xff]  }
  0x28   :  { %291 = vmatpush1.bf16.msra.mxu0 %v2112_v3  ;;  %332 = vmatpush1.bf16.msra.mxu1 %v2113_v4  ;;  %v2119_v8 = vld [vmem:[#allocation5 + $0x128] ss:$16 sps:$4 sm:$0xff]   ;;  %v2120_v9 = vld [vmem:[#allocation5 + $0x144] ss:$16 sps:$4 sm:$0xff]   ;;  %v2122_v10 = vld [vmem:[#allocation5 + $0x14c] ss:$16 sps:$4 sm:$0xff]  }
  0x29   :  { %292 = vmatprep.subr.bf16.mxu0 %v2114_v5  ;;  %333 = vmatprep.subr.bf16.mxu1 %v2116_v6  ;;  %v2124_v11 = vld [vmem:[#allocation5 + $0x140] ss:$16 sps:$4 sm:$0xff]   ;;  %v2125_v12 = vld [vmem:[#allocation5 + $0x148] ss:$16 sps:$4 sm:$0xff]   ;;  %v2126_v13 = vld [vmem:[#allocation5 + $0x164] ss:$16 sps:$4 sm:$0xff]  }
  0x2a   :  { %v2128_v14 = vld [vmem:[#allocation5 + $0x16c] ss:$16 sps:$4 sm:$0xff]   ;;  %v2130_v15 = vld [vmem:[#allocation5 + $0x160] ss:$16 sps:$4 sm:$0xff]   ;;  %v2131_v16 = vld [vmem:[#allocation5 + $0x168] ss:$16 sps:$4 sm:$0xff]  }
  0x2b   :  { %v2132_v17 = vld [vmem:[#allocation5 + $0x184] ss:$16 sps:$4 sm:$0xff]   ;;  %v2134_v18 = vld [vmem:[#allocation5 + $0x18c] ss:$16 sps:$4 sm:$0xff]   ;;  %v2136_v19 = vld [vmem:[#allocation5 + $0x180] ss:$16 sps:$4 sm:$0xff]  }
  0x2c   :  { %293 = vmatpush1.bf16.msra.mxu0 %v2118_v7  ;;  %334 = vmatpush1.bf16.msra.mxu1 %v2119_v8  ;;  %v2137_v20 = vld [vmem:[#allocation5 + $0x188] ss:$16 sps:$4 sm:$0xff]   ;;  %v2138_v21 = vld [vmem:[#allocation5 + $0x1a4] ss:$16 sps:$4 sm:$0xff]   ;;  %v2140_v22 = vld [vmem:[#allocation5 + $0x1ac] ss:$16 sps:$4 sm:$0xff]  }
  0x2d   :  { %294 = vmatprep.subr.bf16.mxu0 %v2120_v9  ;;  %335 = vmatprep.subr.bf16.mxu1 %v2122_v10  ;;  %v2142_v23 = vld [vmem:[#allocation5 + $0x1a0] ss:$16 sps:$4 sm:$0xff]   ;;  %v2143_v24 = vld [vmem:[#allocation5 + $0x1a8] ss:$16 sps:$4 sm:$0xff]   ;;  %v2144_v25 = vld [vmem:[#allocation5 + $0x1c4] ss:$16 sps:$4 sm:$0xff]  }
  0x2e   :  { %v2146_v26 = vld [vmem:[#allocation5 + $0x1cc] ss:$16 sps:$4 sm:$0xff]   ;;  %v2148_v27 = vld [vmem:[#allocation5 + $0x1c0] ss:$16 sps:$4 sm:$0xff]   ;;  %v2149_v28 = vld [vmem:[#allocation5 + $0x1c8] ss:$16 sps:$4 sm:$0xff]  }
  0x2f   :  { %v2150_v29 = vld [vmem:[#allocation5 + $0x1e4] ss:$16 sps:$4 sm:$0xff]   ;;  %v2152_v30 = vld [vmem:[#allocation5 + $0x1ec] ss:$16 sps:$4 sm:$0xff]   ;;  %v2154_v31 = vld [vmem:[#allocation5 + $0x1e0] ss:$16 sps:$4 sm:$0xff]  }
  0x30   :  { %295 = vmatpush1.bf16.msra.mxu0 %v2124_v11  ;;  %336 = vmatpush1.bf16.msra.mxu1 %v2125_v12  ;;  %v2155_v32 = vld [vmem:[#allocation5 + $0x1e8] ss:$16 sps:$4 sm:$0xff]   ;;  %v61_v33 = vld [vmem:[%s2674_s4] sm:$0xff]  ;;  %v2161_v35 = vld [vmem:[#allocation3 + $0xc] ss:$16 sps:$4 sm:$0xff]  }
  0x31   :  { %296 = vmatprep.subr.bf16.mxu0 %v2126_v13  ;;  %337 = vmatprep.subr.bf16.mxu1 %v2128_v14  ;;  %v2158_v34 = vld [vmem:[#allocation3 + $0x4] ss:$16 sps:$4 sm:$0xff]   ;;  %v97_v36 = vpack.c.bf16 %v61_v33, %v61_v33  ;;  %v2156_v37 = vld [vmem:[#allocation3] ss:$16 sps:$4 sm:$0xff]   ;;  %v2159_v38 = vld [vmem:[#allocation3 + $0x8] ss:$16 sps:$4 sm:$0xff]  }
  0x32   :  { %v2164_v39 = vld [vmem:[#allocation3 + $0x24] ss:$16 sps:$4 sm:$0xff]   ;;  %v2167_v40 = vld [vmem:[#allocation3 + $0x2c] ss:$16 sps:$4 sm:$0xff]   ;;  %v2162_v41 = vld [vmem:[#allocation3 + $0x20] ss:$16 sps:$4 sm:$0xff]  }
  0x33   :  { %v2165_v42 = vld [vmem:[#allocation3 + $0x28] ss:$16 sps:$4 sm:$0xff]   ;;  %v2170_v43 = vld [vmem:[#allocation3 + $0x44] ss:$16 sps:$4 sm:$0xff]   ;;  %v2173_v44 = vld [vmem:[#allocation3 + $0x4c] ss:$16 sps:$4 sm:$0xff]  }
  0x34   :  { %297 = vmatpush1.bf16.msra.mxu0 %v2130_v15  ;;  %338 = vmatpush1.bf16.msra.mxu1 %v2131_v16  ;;  %v2168_v45 = vld [vmem:[#allocation3 + $0x40] ss:$16 sps:$4 sm:$0xff]   ;;  %v2171_v46 = vld [vmem:[#allocation3 + $0x48] ss:$16 sps:$4 sm:$0xff]   ;;  %v2176_v47 = vld [vmem:[#allocation3 + $0x64] ss:$16 sps:$4 sm:$0xff]  }
  0x35   :  { %298 = vmatprep.subr.bf16.mxu0 %v2132_v17  ;;  %339 = vmatprep.subr.bf16.mxu1 %v2134_v18  ;;  %v2179_v48 = vld [vmem:[#allocation3 + $0x6c] ss:$16 sps:$4 sm:$0xff]   ;;  %v2174_v49 = vld [vmem:[#allocation3 + $0x60] ss:$16 sps:$4 sm:$0xff]   ;;  %v2177_v50 = vld [vmem:[#allocation3 + $0x68] ss:$16 sps:$4 sm:$0xff]  }
  0x36   :  { %v2182_v51 = vld [vmem:[#allocation3 + $0x84] ss:$16 sps:$4 sm:$0xff]   ;;  %v2185_v52 = vld [vmem:[#allocation3 + $0x8c] ss:$16 sps:$4 sm:$0xff]   ;;  %v2180_v53 = vld [vmem:[#allocation3 + $0x80] ss:$16 sps:$4 sm:$0xff]  }
  0x37   :  { %v2183_v54 = vld [vmem:[#allocation3 + $0x88] ss:$16 sps:$4 sm:$0xff]   ;;  %v2188_v55 = vld [vmem:[#allocation3 + $0xa4] ss:$16 sps:$4 sm:$0xff]   ;;  %v2191_v56 = vld [vmem:[#allocation3 + $0xac] ss:$16 sps:$4 sm:$0xff]  }
  0x38   :  { %299 = vmatpush1.bf16.msra.mxu0 %v2136_v19  ;;  %340 = vmatpush1.bf16.msra.mxu1 %v2137_v20  ;;  %v2186_v57 = vld [vmem:[#allocation3 + $0xa0] ss:$16 sps:$4 sm:$0xff]   ;;  %v2189_v58 = vld [vmem:[#allocation3 + $0xa8] ss:$16 sps:$4 sm:$0xff]   ;;  %v2194_v59 = vld [vmem:[#allocation3 + $0xc4] ss:$16 sps:$4 sm:$0xff]  }
  0x39   :  { %300 = vmatprep.subr.bf16.mxu0 %v2138_v21  ;;  %341 = vmatprep.subr.bf16.mxu1 %v2140_v22  ;;  %v2197_v60 = vld [vmem:[#allocation3 + $0xcc] ss:$16 sps:$4 sm:$0xff]   ;;  %v2192_v61 = vld [vmem:[#allocation3 + $0xc0] ss:$16 sps:$4 sm:$0xff]   ;;  %v2195_v62 = vld [vmem:[#allocation3 + $0xc8] ss:$16 sps:$4 sm:$0xff]  }
  0x3a   :  { %v2200_v63 = vld [vmem:[#allocation3 + $0xe4] ss:$16 sps:$4 sm:$0xff]   ;;  %v2198_v1 = vld [vmem:[#allocation3 + $0xe0] ss:$16 sps:$4 sm:$0xff]   ;;  %v2201_v2 = vld [vmem:[#allocation3 + $0xe8] ss:$16 sps:$4 sm:$0xff]  }
  0x3b   :  { %v63_v3 = vld [vmem:[%s2670_s0] sm:$0xff]  ;;  %v2207_v7 = vld [vmem:[#allocation5 + $0x208] ss:$16 sps:$4 sm:$0xff]   ;;  %v2209_v8 = vld [vmem:[#allocation5 + $0x20c] ss:$16 sps:$4 sm:$0xff]  }
  0x3c   :  { %301 = vmatpush1.bf16.msra.mxu0 %v2142_v23  ;;  %342 = vmatpush1.bf16.msra.mxu1 %v2143_v24  ;;  %v64_v4 = vpack.c.bf16 %v63_v3, %v63_v3  ;;  %v2204_v5 = vld [vmem:[#allocation5 + $0x200] ss:$16 sps:$4 sm:$0xff]   ;;  %v2206_v6 = vld [vmem:[#allocation5 + $0x204] ss:$16 sps:$4 sm:$0xff]   ;;  %v2215_v10 = vld [vmem:[#allocation5 + $0x22c] ss:$16 sps:$4 sm:$0xff]  }
  0x3d   :  { %302 = vmatprep.subr.bf16.mxu0 %v2144_v25  ;;  %343 = vmatprep.subr.bf16.mxu1 %v2146_v26  ;;  %v2212_v9 = vld [vmem:[#allocation5 + $0x224] ss:$16 sps:$4 sm:$0xff]   ;;  %v2210_v11 = vld [vmem:[#allocation5 + $0x220] ss:$16 sps:$4 sm:$0xff]   ;;  %v2213_v12 = vld [vmem:[#allocation5 + $0x228] ss:$16 sps:$4 sm:$0xff]  }
  0x3e   :  { %v2218_v13 = vld [vmem:[#allocation5 + $0x244] ss:$16 sps:$4 sm:$0xff]   ;;  %v2221_v14 = vld [vmem:[#allocation5 + $0x24c] ss:$16 sps:$4 sm:$0xff]   ;;  %v2216_v15 = vld [vmem:[#allocation5 + $0x240] ss:$16 sps:$4 sm:$0xff]  }
  0x3f   :  { %v2219_v16 = vld [vmem:[#allocation5 + $0x248] ss:$16 sps:$4 sm:$0xff]   ;;  %v2224_v17 = vld [vmem:[#allocation5 + $0x264] ss:$16 sps:$4 sm:$0xff]   ;;  %v2227_v18 = vld [vmem:[#allocation5 + $0x26c] ss:$16 sps:$4 sm:$0xff]  }
  0x40   :  { %303 = vmatpush1.bf16.msra.mxu0 %v2148_v27  ;;  %344 = vmatpush1.bf16.msra.mxu1 %v2149_v28  ;;  %v2222_v19 = vld [vmem:[#allocation5 + $0x260] ss:$16 sps:$4 sm:$0xff]   ;;  %v2225_v20 = vld [vmem:[#allocation5 + $0x268] ss:$16 sps:$4 sm:$0xff]   ;;  %v2230_v21 = vld [vmem:[#allocation5 + $0x284] ss:$16 sps:$4 sm:$0xff]  }
  0x41   :  { %304 = vmatprep.subr.bf16.mxu0 %v2150_v29  ;;  %345 = vmatprep.subr.bf16.mxu1 %v2152_v30  ;;  %v2233_v22 = vld [vmem:[#allocation5 + $0x28c] ss:$16 sps:$4 sm:$0xff]   ;;  %v2228_v23 = vld [vmem:[#allocation5 + $0x280] ss:$16 sps:$4 sm:$0xff]   ;;  %v2231_v24 = vld [vmem:[#allocation5 + $0x288] ss:$16 sps:$4 sm:$0xff]  }
  0x42   :  { %v2236_v25 = vld [vmem:[#allocation5 + $0x2a4] ss:$16 sps:$4 sm:$0xff]   ;;  %v2239_v26 = vld [vmem:[#allocation5 + $0x2ac] ss:$16 sps:$4 sm:$0xff]   ;;  %v2234_v27 = vld [vmem:[#allocation5 + $0x2a0] ss:$16 sps:$4 sm:$0xff]  }
  0x43   :  { %v2237_v28 = vld [vmem:[#allocation5 + $0x2a8] ss:$16 sps:$4 sm:$0xff]   ;;  %v2242_v29 = vld [vmem:[#allocation5 + $0x2c4] ss:$16 sps:$4 sm:$0xff]   ;;  %v2245_v30 = vld [vmem:[#allocation5 + $0x2cc] ss:$16 sps:$4 sm:$0xff]  }
  0x44   :  { %305 = vmatpush1.bf16.msra.mxu0 %v2154_v31  ;;  %346 = vmatpush1.bf16.msra.mxu1 %v2155_v32  ;;  %v2240_v31 = vld [vmem:[#allocation5 + $0x2c0] ss:$16 sps:$4 sm:$0xff]   ;;  %v2243_v32 = vld [vmem:[#allocation5 + $0x2c8] ss:$16 sps:$4 sm:$0xff]   ;;  %v2248_v33 = vld [vmem:[#allocation5 + $0x2e4] ss:$16 sps:$4 sm:$0xff]  }
  0x45   :  { %532 = vmatprep.subr.bf16.mxu0 %v2158_v34  ;;  %573 = vmatprep.subr.bf16.mxu1 %v2161_v35  ;;  %v2251_v34 = vld [vmem:[#allocation5 + $0x2ec] ss:$16 sps:$4 sm:$0xff]   ;;  %v2246_v35 = vld [vmem:[#allocation5 + $0x2e0] ss:$16 sps:$4 sm:$0xff]  }
  0x46   :  { %v2294_v3 = vld [vmem:[#allocation5 + $0x3e0] ss:$16 sps:$4 sm:$0xff]  }
  0x47   :  { %323 = vmatmul.mubr.bf16.vlgmr.msra.gmra.mrb[0].mxu0 %v97_v36  ;;  %364 = vmatmul.mubr.bf16.vlgmr.msra.gmra.mrb[0].mxu1 %v97_v36  ;;  %v2249_v36 = vld [vmem:[#allocation5 + $0x2e8] ss:$16 sps:$4 sm:$0xff]  }
  0x48   :  { %533 = vmatpush1.bf16.msra.mxu0 %v2156_v37  ;;  %574 = vmatpush1.bf16.msra.mxu1 %v2159_v38  ;;  %v2254_v37 = vld [vmem:[#allocation5 + $0x304] ss:$16 sps:$4 sm:$0xff]   ;;  %v2257_v38 = vld [vmem:[#allocation5 + $0x30c] ss:$16 sps:$4 sm:$0xff]  }
  0x49   :  { %534 = vmatprep.subr.bf16.mxu0 %v2164_v39  ;;  %575 = vmatprep.subr.bf16.mxu1 %v2167_v40  ;;  %v2252_v39 = vld [vmem:[#allocation5 + $0x300] ss:$16 sps:$4 sm:$0xff]   ;;  %v2255_v40 = vld [vmem:[#allocation5 + $0x308] ss:$16 sps:$4 sm:$0xff]  }
  0x4a   :  { %564 = vmatprep.mubr.bf16.mxu0 %v2486_v0  ;;  %605 = vmatprep.mubr.bf16.mxu1 %v2486_v0  ;;  %v2203_v0 = vld [vmem:[#allocation3 + $0xec] ss:$16 sps:$4 sm:$0xff]  }
  0x4c   :  { %535 = vmatpush1.bf16.msra.mxu0 %v2162_v41  ;;  %576 = vmatpush1.bf16.msra.mxu1 %v2165_v42  ;;  %v2260_v41 = vld [vmem:[#allocation5 + $0x324] ss:$16 sps:$4 sm:$0xff]   ;;  %v2263_v42 = vld [vmem:[#allocation5 + $0x32c] ss:$16 sps:$4 sm:$0xff]  }
  0x4d   :  { %536 = vmatprep.subr.bf16.mxu0 %v2170_v43  ;;  %577 = vmatprep.subr.bf16.mxu1 %v2173_v44  ;;  %v2258_v43 = vld [vmem:[#allocation5 + $0x320] ss:$16 sps:$4 sm:$0xff]   ;;  %v2261_v44 = vld [vmem:[#allocation5 + $0x328] ss:$16 sps:$4 sm:$0xff]  }
  0x50   :  { %537 = vmatpush1.bf16.msra.mxu0 %v2168_v45  ;;  %578 = vmatpush1.bf16.msra.mxu1 %v2171_v46  ;;  %v2266_v45 = vld [vmem:[#allocation5 + $0x344] ss:$16 sps:$4 sm:$0xff]   ;;  %v2269_v46 = vld [vmem:[#allocation5 + $0x34c] ss:$16 sps:$4 sm:$0xff]  }
  0x51   :  { %538 = vmatprep.subr.bf16.mxu0 %v2176_v47  ;;  %579 = vmatprep.subr.bf16.mxu1 %v2179_v48  ;;  %v2264_v47 = vld [vmem:[#allocation5 + $0x340] ss:$16 sps:$4 sm:$0xff]   ;;  %v2267_v48 = vld [vmem:[#allocation5 + $0x348] ss:$16 sps:$4 sm:$0xff]  }
  0x54   :  { %539 = vmatpush1.bf16.msra.mxu0 %v2174_v49  ;;  %580 = vmatpush1.bf16.msra.mxu1 %v2177_v50  ;;  %v2272_v49 = vld [vmem:[#allocation5 + $0x364] ss:$16 sps:$4 sm:$0xff]   ;;  %v2275_v50 = vld [vmem:[#allocation5 + $0x36c] ss:$16 sps:$4 sm:$0xff]  }
  0x55   :  { %540 = vmatprep.subr.bf16.mxu0 %v2182_v51  ;;  %581 = vmatprep.subr.bf16.mxu1 %v2185_v52  ;;  %v2270_v51 = vld [vmem:[#allocation5 + $0x360] ss:$16 sps:$4 sm:$0xff]   ;;  %v2273_v52 = vld [vmem:[#allocation5 + $0x368] ss:$16 sps:$4 sm:$0xff]  }
  0x58   :  { %541 = vmatpush1.bf16.msra.mxu0 %v2180_v53  ;;  %582 = vmatpush1.bf16.msra.mxu1 %v2183_v54  ;;  %v2278_v53 = vld [vmem:[#allocation5 + $0x384] ss:$16 sps:$4 sm:$0xff]   ;;  %v2281_v54 = vld [vmem:[#allocation5 + $0x38c] ss:$16 sps:$4 sm:$0xff]  }
  0x59   :  { %542 = vmatprep.subr.bf16.mxu0 %v2188_v55  ;;  %583 = vmatprep.subr.bf16.mxu1 %v2191_v56  ;;  %v2276_v55 = vld [vmem:[#allocation5 + $0x380] ss:$16 sps:$4 sm:$0xff]   ;;  %v2279_v56 = vld [vmem:[#allocation5 + $0x388] ss:$16 sps:$4 sm:$0xff]  }
  0x5c   :  { %543 = vmatpush1.bf16.msra.mxu0 %v2186_v57  ;;  %584 = vmatpush1.bf16.msra.mxu1 %v2189_v58  ;;  %v2284_v57 = vld [vmem:[#allocation5 + $0x3a4] ss:$16 sps:$4 sm:$0xff]   ;;  %v2287_v58 = vld [vmem:[#allocation5 + $0x3ac] ss:$16 sps:$4 sm:$0xff]  }
  0x5d   :  { %544 = vmatprep.subr.bf16.mxu0 %v2194_v59  ;;  %585 = vmatprep.subr.bf16.mxu1 %v2197_v60  ;;  %v2282_v59 = vld [vmem:[#allocation5 + $0x3a0] ss:$16 sps:$4 sm:$0xff]   ;;  %v2285_v60 = vld [vmem:[#allocation5 + $0x3a8] ss:$16 sps:$4 sm:$0xff]  }
  0x60   :  { %545 = vmatpush1.bf16.msra.mxu0 %v2192_v61  ;;  %586 = vmatpush1.bf16.msra.mxu1 %v2195_v62  ;;  %v2290_v61 = vld [vmem:[#allocation5 + $0x3c4] ss:$16 sps:$4 sm:$0xff]   ;;  %v2293_v62 = vld [vmem:[#allocation5 + $0x3cc] ss:$16 sps:$4 sm:$0xff]  }
  0x61   :  { %546 = vmatprep.subr.bf16.mxu0 %v2200_v63  ;;  %587 = vmatprep.subr.bf16.mxu1 %v2203_v0  ;;  %v2288_v63 = vld [vmem:[#allocation5 + $0x3c0] ss:$16 sps:$4 sm:$0xff]   ;;  %v2291_v0 = vld [vmem:[#allocation5 + $0x3c8] ss:$16 sps:$4 sm:$0xff]  }
  0x64   :  { %547 = vmatpush1.bf16.msra.mxu0 %v2198_v1  ;;  %588 = vmatpush1.bf16.msra.mxu1 %v2201_v2  ;;  %v2296_v1 = vld [vmem:[#allocation5 + $0x3e4] ss:$16 sps:$4 sm:$0xff]   ;;  %v2299_v2 = vld [vmem:[#allocation5 + $0x3ec] ss:$16 sps:$4 sm:$0xff]  }
  0x65   :  { %1084 = vmatprep.subr.bf16.mxu0 %v2206_v6  ;;  %1125 = vmatprep.subr.bf16.mxu1 %v2209_v8  ;;  %v2305_v8 = vld [vmem:[#allocation5 + $0x40c] ss:$16 sps:$4 sm:$0xff]  }
  0x67   :  { %565 = vmatmul.mubr.bf16.vlgmr.msra.gmra.mrb[4].mxu0 %v64_v4  ;;  %606 = vmatmul.mubr.bf16.vlgmr.msra.gmra.mrb[4].mxu1 %v64_v4  ;;  %v2297_v4 = vld [vmem:[#allocation5 + $0x3e8] ss:$16 sps:$4 sm:$0xff]  }
  0x68   :  { %1085 = vmatpush1.bf16.msra.mxu0 %v2204_v5  ;;  %1126 = vmatpush1.bf16.msra.mxu1 %v2207_v7  ;;  %v1907_v5 = vld [vmem:[%s2674_s4 + $0x8] sm:$0xff]  ;;  %v2302_v7 = vld [vmem:[#allocation5 + $0x404] ss:$16 sps:$4 sm:$0xff]  }
  0x69   :  { %1086 = vmatprep.subr.bf16.mxu0 %v2212_v9  ;;  %1127 = vmatprep.subr.bf16.mxu1 %v2215_v10  ;;  %v2069_v6 = vpack.c.bf16 %v1907_v5, %v1907_v5  ;;  %v2309_v5 = vld [vmem:[#allocation5 + $0x428] ss:$16 sps:$4 sm:$0xff]  }
  0x6b   :  { %1116 = vmatprep.mubr.bf16.mxu0 %v2069_v6  ;;  %1157 = vmatprep.mubr.bf16.mxu1 %v2069_v6  ;;  %v2314_v6 = vld [vmem:[#allocation5 + $0x444] ss:$16 sps:$4 sm:$0xff]  }
  0x6c   :  { %1087 = vmatpush1.bf16.msra.mxu0 %v2210_v11  ;;  %1128 = vmatpush1.bf16.msra.mxu1 %v2213_v12 }
  0x6d   :  { %1088 = vmatprep.subr.bf16.mxu0 %v2218_v13  ;;  %1129 = vmatprep.subr.bf16.mxu1 %v2221_v14 }
  0x70   :  { %1089 = vmatpush1.bf16.msra.mxu0 %v2216_v15  ;;  %1130 = vmatpush1.bf16.msra.mxu1 %v2219_v16 }
  0x71   :  { %1090 = vmatprep.subr.bf16.mxu0 %v2224_v17  ;;  %1131 = vmatprep.subr.bf16.mxu1 %v2227_v18  ;;  %v616_v17 = vlaneseq }
  0x73   :  { %v617_v18 = vshrl.u32 %v616_v17, 7  ;;  %v2327_v17 = vld [vmem:[#allocation5 + $0x488] ss:$16 sps:$4 sm:$0xff]  }
  0x74   :  { %1091 = vmatpush1.bf16.msra.mxu0 %v2222_v19  ;;  %1132 = vmatpush1.bf16.msra.mxu1 %v2225_v20  ;;  %v614_v20 = vld [vmem:[%s2673_s3] sm:$0xf] }
  0x75   :  { %1092 = vmatprep.subr.bf16.mxu0 %v2230_v21  ;;  %1133 = vmatprep.subr.bf16.mxu1 %v2233_v22  ;;  %v2581_v19 = vsub.s32 0, %v617_v18  ;;  %v2586_v21 = vsub.s32 1, %v617_v18 }
  0x77   :  { %v619_v22 = vrot.slane %v614_v20, %v2581_v19 }
  0x78   :  { %1093 = vmatpush1.bf16.msra.mxu0 %v2228_v23  ;;  %1134 = vmatpush1.bf16.msra.mxu1 %v2231_v24  ;;  %v2589_v23 = vsub.s32 2, %v617_v18 }
  0x79   :  { %1094 = vmatprep.subr.bf16.mxu0 %v2236_v25  ;;  %1135 = vmatprep.subr.bf16.mxu1 %v2239_v26  ;;  %v623_v26 = vrot.slane %v614_v20, %v2586_v21 }
  0x7c   :  { %1095 = vmatpush1.bf16.msra.mxu0 %v2234_v27  ;;  %1136 = vmatpush1.bf16.msra.mxu1 %v2237_v28 }
  0x7d   :  { %1096 = vmatprep.subr.bf16.mxu0 %v2242_v29  ;;  %1137 = vmatprep.subr.bf16.mxu1 %v2245_v30 }
  0x80   :  { %1097 = vmatpush1.bf16.msra.mxu0 %v2240_v31  ;;  %1138 = vmatpush1.bf16.msra.mxu1 %v2243_v32 }
  0x81   :  { %1098 = vmatprep.subr.bf16.mxu0 %v2248_v33  ;;  %1139 = vmatprep.subr.bf16.mxu1 %v2251_v34 }
  0x84   :  { %1099 = vmatpush1.bf16.msra.mxu0 %v2246_v35  ;;  %1140 = vmatpush1.bf16.msra.mxu1 %v2249_v36  ;;  %v627_v36 = vrot.slane %v614_v20, %v2589_v23 }
  0x85   :  { %1100 = vmatprep.subr.bf16.mxu0 %v2254_v37  ;;  %1141 = vmatprep.subr.bf16.mxu1 %v2257_v38  ;;  %v2593_v37 = vsub.s32 3, %v617_v18  ;;  %v2332_v18 = vld [vmem:[#allocation5 + $0x4a4] ss:$16 sps:$4 sm:$0xff]  }
  0x88   :  { %1101 = vmatpush1.bf16.msra.mxu0 %v2252_v39  ;;  %1142 = vmatpush1.bf16.msra.mxu1 %v2255_v40 }
  0x89   :  { %1102 = vmatprep.subr.bf16.mxu0 %v2260_v41  ;;  %1143 = vmatprep.subr.bf16.mxu1 %v2263_v42 }
  0x8c   :  { %1103 = vmatpush1.bf16.msra.mxu0 %v2258_v43  ;;  %1144 = vmatpush1.bf16.msra.mxu1 %v2261_v44  ;;  %v631_v44 = vrot.slane %v614_v20, %v2593_v37  ;;  %v2335_v20 = vld [vmem:[#allocation5 + $0x4ac] ss:$16 sps:$4 sm:$0xff]  }
  0x8d   :  { %1104 = vmatprep.subr.bf16.mxu0 %v2266_v45  ;;  %1145 = vmatprep.subr.bf16.mxu1 %v2269_v46 }
  0x90   :  { %1105 = vmatpush1.bf16.msra.mxu0 %v2264_v47  ;;  %1146 = vmatpush1.bf16.msra.mxu1 %v2267_v48 }
  0x91   :  { %1106 = vmatprep.subr.bf16.mxu0 %v2272_v49  ;;  %1147 = vmatprep.subr.bf16.mxu1 %v2275_v50 }
  0x94   :  { %1107 = vmatpush1.bf16.msra.mxu0 %v2270_v51  ;;  %1148 = vmatpush1.bf16.msra.mxu1 %v2273_v52  ;;  %v62_v52 = vld [vmem:[%s2675_s5] sm:$0xff] }
  0x95   :  { %1108 = vmatprep.subr.bf16.mxu0 %v2278_v53  ;;  %1149 = vmatprep.subr.bf16.mxu1 %v2281_v54 }
  0x98   :  { %1109 = vmatpush1.bf16.msra.mxu0 %v2276_v55  ;;  %1150 = vmatpush1.bf16.msra.mxu1 %v2279_v56 }
  0x99   :  { %1110 = vmatprep.subr.bf16.mxu0 %v2284_v57  ;;  %1151 = vmatprep.subr.bf16.mxu1 %v2287_v58 }
  0x9c   :  { %1111 = vmatpush1.bf16.msra.mxu0 %v2282_v59  ;;  %1152 = vmatpush1.bf16.msra.mxu1 %v2285_v60 }
  0x9d   :  { %1112 = vmatprep.subr.bf16.mxu0 %v2290_v61  ;;  %1153 = vmatprep.subr.bf16.mxu1 %v2293_v62 }
  0xa0   :  { %1113 = vmatpush1.bf16.msra.mxu0 %v2288_v63  ;;  %1154 = vmatpush1.bf16.msra.mxu1 %v2291_v0  ;;  %v2300_v63 = vld [vmem:[#allocation5 + $0x400] ss:$16 sps:$4 sm:$0xff]   ;;  %v2303_v0 = vld [vmem:[#allocation5 + $0x408] ss:$16 sps:$4 sm:$0xff]  }
  0xa1   :  { %1114 = vmatprep.subr.bf16.mxu0 %v2296_v1  ;;  %1155 = vmatprep.subr.bf16.mxu1 %v2299_v2  ;;  %v2308_v2 = vld [vmem:[#allocation5 + $0x424] ss:$16 sps:$4 sm:$0xff]  }
  0xa4   :  { %1115 = vmatpush1.bf16.msra.mxu0 %v2294_v3  ;;  %1156 = vmatpush1.bf16.msra.mxu1 %v2297_v4  ;;  %v2311_v3 = vld [vmem:[#allocation5 + $0x42c] ss:$16 sps:$4 sm:$0xff]   ;;  %v2306_v4 = vld [vmem:[#allocation5 + $0x420] ss:$16 sps:$4 sm:$0xff]  }
  0xa5   :  { %1612 = vmatprep.subr.bf16.mxu0 %v2302_v7  ;;  %1653 = vmatprep.subr.bf16.mxu1 %v2305_v8  ;;  %v2317_v7 = vld [vmem:[#allocation5 + $0x44c] ss:$16 sps:$4 sm:$0xff]   ;;  %v2312_v8 = vld [vmem:[#allocation5 + $0x440] ss:$16 sps:$4 sm:$0xff]  }
 0x11a   :  { %v324_v9 = vpop.f32.mrb[0].mxu0  ;;  %v365_v10 = vpop.f32.mrb[0].mxu1 }
 0x11b   :  { %v326_v11 = vpop.f32.mrb[1].mxu0  ;;  %v367_v12 = vpop.f32.mrb[1].mxu1 }
 0x11c   :  { %v328_v13 = vpop.f32.mrb[2].mxu0  ;;  %v369_v14 = vpop.f32.mrb[2].mxu1 }
 0x11d   :  { %v329_v15 = vpop.f32.mrb[3].mxu0  ;;  %v370_v16 = vpop.f32.mrb[3].mxu1  ;;  %v2321_v13 = vld [vmem:[#allocation5 + $0x468] ss:$16 sps:$4 sm:$0xff]   ;;  %v2326_v14 = vld [vmem:[#allocation5 + $0x484] ss:$16 sps:$4 sm:$0xff]  }
 0x11e   :  { %v2329_v15 = vld [vmem:[#allocation5 + $0x48c] ss:$16 sps:$4 sm:$0xff]   ;;  %v2324_v16 = vld [vmem:[#allocation5 + $0x480] ss:$16 sps:$4 sm:$0xff]  }
 0x13a   :  { %v566_v24 = vpop.f32.mrb[4].mxu0  ;;  %v607_v25 = vpop.f32.mrb[4].mxu1 }
 0x13b   :  { %v567_v27 = vadd.f32 %v566_v24, %v324_v9  ;;  %v608_v28 = vadd.f32 %v607_v25, %v365_v10  ;;  %v568_v29 = vpop.f32.mrb[5].mxu0  ;;  %v609_v30 = vpop.f32.mrb[5].mxu1  ;;  %v2315_v9 = vld [vmem:[#allocation5 + $0x448] ss:$16 sps:$4 sm:$0xff]   ;;  %v2320_v10 = vld [vmem:[#allocation5 + $0x464] ss:$16 sps:$4 sm:$0xff]  }
 0x13c   :  { %v569_v31 = vadd.f32 %v568_v29, %v326_v11  ;;  %v610_v32 = vadd.f32 %v609_v30, %v367_v12  ;;  %v570_v33 = vpop.f32.mrb[6].mxu0  ;;  %v611_v34 = vpop.f32.mrb[6].mxu1  ;;  %v2323_v11 = vld [vmem:[#allocation5 + $0x46c] ss:$16 sps:$4 sm:$0xff]   ;;  %v2318_v12 = vld [vmem:[#allocation5 + $0x460] ss:$16 sps:$4 sm:$0xff]  }
 0x13d   :  { %v636_v35 = vadd.f32 %v619_v22, %v567_v27  ;;  %v571_v38 = vpop.f32.mrb[7].mxu0  ;;  %v612_v39 = vpop.f32.mrb[7].mxu1  ;;  %v638_v43 = vadd.f32 %v627_v36, %v608_v28  ;;  %v2330_v22 = vld [vmem:[#allocation5 + $0x4a0] ss:$16 sps:$4 sm:$0xff]   ;;  %v2333_v24 = vld [vmem:[#allocation5 + $0x4a8] ss:$16 sps:$4 sm:$0xff]  }
 0x13e   :  { %v637_v40 = vadd.f32 %v623_v26, %v569_v31  ;;  %v639_v45 = vadd.f32 %v631_v44, %v610_v32  ;;  %v2338_v25 = vld [vmem:[#allocation5 + $0x4c4] ss:$16 sps:$4 sm:$0xff]   ;;  %v2341_v26 = vld [vmem:[#allocation5 + $0x4cc] ss:$16 sps:$4 sm:$0xff]   ;;  %v2336_v27 = vld [vmem:[#allocation5 + $0x4c0] ss:$16 sps:$4 sm:$0xff]  }
 0x13f   :  { %v640_v41 = vmul.f32 0.5, %v636_v35  ;;  %v2339_v28 = vld [vmem:[#allocation5 + $0x4c8] ss:$16 sps:$4 sm:$0xff]   ;;  %v2344_v29 = vld [vmem:[#allocation5 + $0x4e4] ss:$16 sps:$4 sm:$0xff]  }
 0x140   :  { %v644_v42 = vmul.f32 0.5, %v637_v40  ;;  %v649_v46 = vmul.f32 0.5, %v639_v45  ;;  %v2347_v30 = vld [vmem:[#allocation5 + $0x4ec] ss:$16 sps:$4 sm:$0xff]   ;;  %v2342_v31 = vld [vmem:[#allocation5 + $0x4e0] ss:$16 sps:$4 sm:$0xff]  }
 0x141   :  { %2404 = vtanh.f32 %v640_v41  ;;  %v2345_v32 = vld [vmem:[#allocation5 + $0x4e8] ss:$16 sps:$4 sm:$0xff]   ;;  %v2350_v33 = vld [vmem:[#allocation5 + $0x504] ss:$16 sps:$4 sm:$0xff]   ;;  %v2353_v34 = vld [vmem:[#allocation5 + $0x50c] ss:$16 sps:$4 sm:$0xff]  }
 0x142   :  { %2406 = vtanh.f32 %v644_v42  ;;  %v2348_v35 = vld [vmem:[#allocation5 + $0x500] ss:$16 sps:$4 sm:$0xff]   ;;  %v2351_v36 = vld [vmem:[#allocation5 + $0x508] ss:$16 sps:$4 sm:$0xff]   ;;  %v2356_v38 = vld [vmem:[#allocation5 + $0x524] ss:$16 sps:$4 sm:$0xff]  }
 0x143   :  { %2408 = vtanh.f32 %v638_v43  ;;  %v2359_v39 = vld [vmem:[#allocation5 + $0x52c] ss:$16 sps:$4 sm:$0xff]   ;;  %v2354_v40 = vld [vmem:[#allocation5 + $0x520] ss:$16 sps:$4 sm:$0xff]   ;;  %v2357_v41 = vld [vmem:[#allocation5 + $0x528] ss:$16 sps:$4 sm:$0xff]  }
 0x144   :  { %2410 = vtanh.f32 %v649_v46  ;;  %v2362_v42 = vld [vmem:[#allocation5 + $0x544] ss:$16 sps:$4 sm:$0xff]   ;;  %v2365_v43 = vld [vmem:[#allocation5 + $0x54c] ss:$16 sps:$4 sm:$0xff]   ;;  %v2360_v44 = vld [vmem:[#allocation5 + $0x540] ss:$16 sps:$4 sm:$0xff]  }
 0x145   :  { %v2363_v45 = vld [vmem:[#allocation5 + $0x548] ss:$16 sps:$4 sm:$0xff]   ;;  %v2368_v46 = vld [vmem:[#allocation5 + $0x564] ss:$16 sps:$4 sm:$0xff]  }
 0x14b   :  { %v2405_v47 = vpop.eup %2404 }
 0x14c   :  { %v2407_v48 = vpop.eup %2406  ;;  %v642_v49 = vmul.f32 0.5, %v2405_v47  ;;  %v2371_v47 = vld [vmem:[#allocation5 + $0x56c] ss:$16 sps:$4 sm:$0xff]  }
 0x14d   :  { %v646_v50 = vmul.f32 0.5, %v2407_v48  ;;  %v2409_v53 = vpop.eup %2408  ;;  %v2366_v48 = vld [vmem:[#allocation5 + $0x560] ss:$16 sps:$4 sm:$0xff]  }
 0x14e   :  { %v643_v51 = vadd.f32 0.5, %v642_v49  ;;  %v2411_v58 = vpop.eup %2410  ;;  %v2369_v49 = vld [vmem:[#allocation5 + $0x568] ss:$16 sps:$4 sm:$0xff]  }
 0x14f   :  { %v647_v54 = vadd.f32 0.5, %v646_v50  ;;  %v651_v59 = vmul.f32 0.5, %v2411_v58  ;;  %v2374_v50 = vld [vmem:[#allocation5 + $0x584] ss:$16 sps:$4 sm:$0xff]  }
 0x150   :  { %v654_v55 = vmul.f32 %v2409_v53, %v643_v51  ;;  %v2377_v51 = vld [vmem:[#allocation5 + $0x58c] ss:$16 sps:$4 sm:$0xff]   ;;  %v2375_v53 = vld [vmem:[#allocation5 + $0x588] ss:$16 sps:$4 sm:$0xff]   ;;  %v2386_v58 = vld [vmem:[#allocation5 + $0x5c4] ss:$16 sps:$4 sm:$0xff]  }
 0x151   :  { %v653_v56 = vmul.f32 %v647_v54, %v62_v52  ;;  %v652_v60 = vadd.f32 0.5, %v651_v59  ;;  %v2372_v52 = vld [vmem:[#allocation5 + $0x580] ss:$16 sps:$4 sm:$0xff]   ;;  %v2380_v54 = vld [vmem:[#allocation5 + $0x5a4] ss:$16 sps:$4 sm:$0xff]  }
 0x152   :  { %v2389_v59 = vld [vmem:[#allocation5 + $0x5cc] ss:$16 sps:$4 sm:$0xff]  }
 0x153   :  { %v655_v57 = vadd.f32 %v654_v55, %v653_v56  ;;  %v2383_v55 = vld [vmem:[#allocation5 + $0x5ac] ss:$16 sps:$4 sm:$0xff]   ;;  %v2378_v56 = vld [vmem:[#allocation5 + $0x5a0] ss:$16 sps:$4 sm:$0xff]  }
 0x155   :  { %2412 = vtanh.f32 %v655_v57  ;;  %659 = vst [vmem:[%s2679_s9] sm:$0xff] %v655_v57  ;;  %v2381_v57 = vld [vmem:[#allocation5 + $0x5a8] ss:$16 sps:$4 sm:$0xff]  }
 0x15f   :  { %v2413_v61 = vpop.eup %2412 }
 0x160   :  { %v657_v62 = vmul.f32 %v2413_v61, %v652_v60  ;;  %v2384_v60 = vld [vmem:[#allocation5 + $0x5c0] ss:$16 sps:$4 sm:$0xff]   ;;  %v2387_v61 = vld [vmem:[#allocation5 + $0x5c8] ss:$16 sps:$4 sm:$0xff]  }
 0x162   :  { %658 = vst [vmem:[%s2678_s8] sm:$0xff] %v657_v62  ;;  %v2068_v1 = vpack.c.bf16 %v657_v62, %v657_v62  ;;  %v2392_v62 = vld [vmem:[#allocation5 + $0x5e4] ss:$16 sps:$4 sm:$0xff]  }
 0x164   :  { %1117 = vmatmul.mubr.bf16.vlgmr.msra.gmra.mrb[8].mxu0 %v2068_v1  ;;  %1158 = vmatmul.mubr.bf16.vlgmr.msra.gmra.mrb[8].mxu1 %v2068_v1  ;;  %v2393_v1 = vld [vmem:[#allocation5 + $0x5e8] ss:$16 sps:$4 sm:$0xff]  }
 0x165   :  { %1613 = vmatpush1.bf16.msra.mxu0 %v2300_v63  ;;  %1654 = vmatpush1.bf16.msra.mxu1 %v2303_v0  ;;  %v2395_v63 = vld [vmem:[#allocation5 + $0x5ec] ss:$16 sps:$4 sm:$0xff]   ;;  %v2390_v0 = vld [vmem:[#allocation5 + $0x5e0] ss:$16 sps:$4 sm:$0xff]  }
 0x166   :  { %1614 = vmatprep.subr.bf16.mxu0 %v2308_v2  ;;  %1655 = vmatprep.subr.bf16.mxu1 %v2311_v3 }
 0x169   :  { %1615 = vmatpush1.bf16.msra.mxu0 %v2306_v4  ;;  %1656 = vmatpush1.bf16.msra.mxu1 %v2309_v5  ;;  %v1978_v2 = vld [vmem:[%s2674_s4 + $0x10] sm:$0xff]  ;;  %v1909_v4 = vld [vmem:[%s2673_s3 + $0x4] sm:$0xf] }
 0x16a   :  { %1616 = vmatprep.subr.bf16.mxu0 %v2314_v6  ;;  %1657 = vmatprep.subr.bf16.mxu1 %v2317_v7  ;;  %v2071_v3 = vpack.c.bf16 %v1978_v2, %v1978_v2  ;;  %v740_v5 = vrot.slane %v1909_v4, %v2581_v19  ;;  %v744_v6 = vrot.slane %v1909_v4, %v2586_v21 }
 0x16c   :  { %1644 = vmatprep.mubr.bf16.mxu0 %v2071_v3  ;;  %1685 = vmatprep.mubr.bf16.mxu1 %v2071_v3 }
 0x16d   :  { %1617 = vmatpush1.bf16.msra.mxu0 %v2312_v8  ;;  %1658 = vmatpush1.bf16.msra.mxu1 %v2315_v9 }
 0x16e   :  { %1618 = vmatprep.subr.bf16.mxu0 %v2320_v10  ;;  %1659 = vmatprep.subr.bf16.mxu1 %v2323_v11  ;;  %v748_v10 = vrot.slane %v1909_v4, %v2589_v23 }
 0x171   :  { %1619 = vmatpush1.bf16.msra.mxu0 %v2318_v12  ;;  %1660 = vmatpush1.bf16.msra.mxu1 %v2321_v13 }
 0x172   :  { %1620 = vmatprep.subr.bf16.mxu0 %v2326_v14  ;;  %1661 = vmatprep.subr.bf16.mxu1 %v2329_v15 }
 0x175   :  { %1621 = vmatpush1.bf16.msra.mxu0 %v2324_v16  ;;  %1662 = vmatpush1.bf16.msra.mxu1 %v2327_v17 }
 0x176   :  { %1622 = vmatprep.subr.bf16.mxu0 %v2332_v18  ;;  %1663 = vmatprep.subr.bf16.mxu1 %v2335_v20 }
 0x179   :  { %1623 = vmatpush1.bf16.msra.mxu0 %v2330_v22  ;;  %1664 = vmatpush1.bf16.msra.mxu1 %v2333_v24  ;;  %v752_v24 = vrot.slane %v1909_v4, %v2593_v37 }
 0x17a   :  { %1624 = vmatprep.subr.bf16.mxu0 %v2338_v25  ;;  %1665 = vmatprep.subr.bf16.mxu1 %v2341_v26 }
 0x17d   :  { %1625 = vmatpush1.bf16.msra.mxu0 %v2336_v27  ;;  %1666 = vmatpush1.bf16.msra.mxu1 %v2339_v28 }
 0x17e   :  { %1626 = vmatprep.subr.bf16.mxu0 %v2344_v29  ;;  %1667 = vmatprep.subr.bf16.mxu1 %v2347_v30 }
 0x181   :  { %1627 = vmatpush1.bf16.msra.mxu0 %v2342_v31  ;;  %1668 = vmatpush1.bf16.msra.mxu1 %v2345_v32  ;;  %v1908_v32 = vld [vmem:[%s2675_s5 + $0x8] sm:$0xff] }
 0x182   :  { %1628 = vmatprep.subr.bf16.mxu0 %v2350_v33  ;;  %1669 = vmatprep.subr.bf16.mxu1 %v2353_v34 }
 0x185   :  { %1629 = vmatpush1.bf16.msra.mxu0 %v2348_v35  ;;  %1670 = vmatpush1.bf16.msra.mxu1 %v2351_v36 }
 0x186   :  { %1630 = vmatprep.subr.bf16.mxu0 %v2356_v38  ;;  %1671 = vmatprep.subr.bf16.mxu1 %v2359_v39 }
 0x189   :  { %1631 = vmatpush1.bf16.msra.mxu0 %v2354_v40  ;;  %1672 = vmatpush1.bf16.msra.mxu1 %v2357_v41 }
 0x18a   :  { %1632 = vmatprep.subr.bf16.mxu0 %v2362_v42  ;;  %1673 = vmatprep.subr.bf16.mxu1 %v2365_v43 }
 0x18d   :  { %1633 = vmatpush1.bf16.msra.mxu0 %v2360_v44  ;;  %1674 = vmatpush1.bf16.msra.mxu1 %v2363_v45  ;;  %v2396_v45 = vld [vmem:[%s2676_s6] sm:$0xff]  }
 0x18e   :  { %1634 = vmatprep.subr.bf16.mxu0 %v2368_v46  ;;  %1675 = vmatprep.subr.bf16.mxu1 %v2371_v47  ;;  %v2487_v46 = vmov 0.0   ;;  %v2397_v47 = vld [vmem:[%s2676_s6 + $0x8] sm:$0xff]  }
 0x191   :  { %1635 = vmatpush1.bf16.msra.mxu0 %v2366_v48  ;;  %1676 = vmatpush1.bf16.msra.mxu1 %v2369_v49  ;;  %v2398_v48 = vld [vmem:[%s2676_s6 + $0x10] sm:$0xff]   ;;  %v2399_v49 = vld [vmem:[%s2676_s6 + $0x18] sm:$0xff]  }
 0x192   :  { %1636 = vmatprep.subr.bf16.mxu0 %v2374_v50  ;;  %1677 = vmatprep.subr.bf16.mxu1 %v2377_v51  ;;  %v2400_v50 = vld [vmem:[%s2676_s6 + $0x20] sm:$0xff]   ;;  %v2401_v51 = vld [vmem:[%s2676_s6 + $0x28] sm:$0xff]  }
 0x195   :  { %1637 = vmatpush1.bf16.msra.mxu0 %v2372_v52  ;;  %1678 = vmatpush1.bf16.msra.mxu1 %v2375_v53  ;;  %v2402_v52 = vld [vmem:[%s2676_s6 + $0x30] sm:$0xff]   ;;  %v2403_v53 = vld [vmem:[%s2676_s6 + $0x38] sm:$0xff]  }
 0x196   :  { %1638 = vmatprep.subr.bf16.mxu0 %v2380_v54  ;;  %1679 = vmatprep.subr.bf16.mxu1 %v2383_v55  ;;  %v1980_v54 = vld [vmem:[%s2673_s3 + $0x8] sm:$0xf] }
 0x197   :  { %v1268_v55 = vrot.slane %v1980_v54, %v2581_v19  ;;  %v1280_v19 = vrot.slane %v1980_v54, %v2593_v37 }
 0x199   :  { %1639 = vmatpush1.bf16.msra.mxu0 %v2378_v56  ;;  %1680 = vmatpush1.bf16.msra.mxu1 %v2381_v57  ;;  %v1272_v56 = vrot.slane %v1980_v54, %v2586_v21 }
 0x19a   :  { %1640 = vmatprep.subr.bf16.mxu0 %v2386_v58  ;;  %1681 = vmatprep.subr.bf16.mxu1 %v2389_v59 }
 0x19d   :  { %1641 = vmatpush1.bf16.msra.mxu0 %v2384_v60  ;;  %1682 = vmatpush1.bf16.msra.mxu1 %v2387_v61  ;;  %v1276_v60 = vrot.slane %v1980_v54, %v2589_v23 }
 0x19e   :  { %1642 = vmatprep.subr.bf16.mxu0 %v2392_v62  ;;  %1683 = vmatprep.subr.bf16.mxu1 %v2395_v63 }
 0x1a1   :  { %1643 = vmatpush1.bf16.msra.mxu0 %v2390_v0  ;;  %1684 = vmatpush1.bf16.msra.mxu1 %v2393_v1 }
 0x1a2   :  { %2081 = vmatprep.subr.bf16.mxu0 %v2487_v46 }
 0x237   :  { %v1118_v7 = vpop.f32.mrb[8].mxu0  ;;  %v1159_v8 = vpop.f32.mrb[8].mxu1 }
 0x238   :  { %v1119_v9 = vadd.f32 %v1118_v7, %v740_v5  ;;  %v1120_v11 = vpop.f32.mrb[9].mxu0  ;;  %v1161_v12 = vpop.f32.mrb[9].mxu1  ;;  %v1160_v22 = vadd.f32 %v1159_v8, %v748_v10 }
 0x239   :  { %v1121_v13 = vadd.f32 %v1120_v11, %v744_v6  ;;  %v1122_v14 = vpop.f32.mrb[10].mxu0  ;;  %v1163_v15 = vpop.f32.mrb[10].mxu1  ;;  %v1162_v25 = vadd.f32 %v1161_v12, %v752_v24 }
 0x23a   :  { %v1166_v16 = vmul.f32 0.5, %v1119_v9  ;;  %v1123_v17 = vpop.f32.mrb[11].mxu0  ;;  %v1164_v18 = vpop.f32.mrb[11].mxu1 }
 0x23b   :  { %v1170_v20 = vmul.f32 0.5, %v1121_v13  ;;  %v1175_v26 = vmul.f32 0.5, %v1162_v25 }
 0x23c   :  { %2414 = vtanh.f32 %v1166_v16 }
 0x23d   :  { %2416 = vtanh.f32 %v1170_v20 }
 0x23e   :  { %2418 = vtanh.f32 %v1160_v22 }
 0x23f   :  { %2420 = vtanh.f32 %v1175_v26  ;;  %v2049_v26 = vld [vmem:[%s2677_s7] ss:$0 sm:$0xff] }
 0x246   :  { %v2415_v27 = vpop.eup %2414 }
 0x247   :  { %v2417_v28 = vpop.eup %2416  ;;  %v1168_v29 = vmul.f32 0.5, %v2415_v27 }
 0x248   :  { %v1172_v30 = vmul.f32 0.5, %v2417_v28  ;;  %v2419_v33 = vpop.eup %2418 }
 0x249   :  { %v1169_v31 = vadd.f32 0.5, %v1168_v29  ;;  %v2421_v39 = vpop.eup %2420 }
 0x24a   :  { %v1173_v34 = vadd.f32 0.5, %v1172_v30  ;;  %v1177_v40 = vmul.f32 0.5, %v2421_v39 }
 0x24b   :  { %v1180_v35 = vmul.f32 %v2419_v33, %v1169_v31 }
 0x24c   :  { %v1179_v36 = vmul.f32 %v1908_v32, %v1173_v34  ;;  %v1178_v41 = vadd.f32 0.5, %v1177_v40 }
 0x24e   :  { %v1181_v38 = vadd.f32 %v1180_v35, %v1179_v36 }
 0x250   :  { %2422 = vtanh.f32 %v1181_v38  ;;  %1977 = vst [vmem:[%s2679_s9 + $0x8] sm:$0xff] %v1181_v38 }
 0x257   :  { %v1979_v12 = vld [vmem:[%s2675_s5 + $0x10] sm:$0xff] }
 0x25a   :  { %v2423_v42 = vpop.eup %2422 }
 0x25b   :  { %v1183_v43 = vmul.f32 %v2423_v42, %v1178_v41 }
 0x25d   :  { %1976 = vst [vmem:[%s2678_s8 + $0x8] sm:$0xff] %v1183_v43  ;;  %v2070_v44 = vpack.c.bf16 %v1183_v43, %v1183_v43 }
 0x25f   :  { %1645 = vmatmul.mubr.bf16.vlgmr.msra.gmra.mrb[12].mxu0 %v2070_v44  ;;  %1686 = vmatmul.mubr.bf16.vlgmr.msra.gmra.mrb[12].mxu1 %v2070_v44 }
 0x260   :  { %2082 = vmatpush3.bf16.msra.mxu0 %v2396_v45  ;;  %2097 = vmatprep.mubr.msk.bf16.mxu0 %vm2488_vm0, %v2487_v46 }
 0x261   :  { %2083 = vmatprep.subr.bf16.mxu0 %v2487_v46 }
 0x264   :  { %2084 = vmatpush3.bf16.msra.mxu0 %v2397_v47 }
 0x265   :  { %2085 = vmatprep.subr.bf16.mxu0 %v2487_v46 }
 0x268   :  { %2086 = vmatpush3.bf16.msra.mxu0 %v2398_v48 }
 0x269   :  { %2087 = vmatprep.subr.bf16.mxu0 %v2487_v46 }
 0x26c   :  { %2088 = vmatpush3.bf16.msra.mxu0 %v2399_v49 }
 0x26d   :  { %2089 = vmatprep.subr.bf16.mxu0 %v2487_v46 }
 0x270   :  { %2090 = vmatpush3.bf16.msra.mxu0 %v2400_v50 }
 0x271   :  { %2091 = vmatprep.subr.bf16.mxu0 %v2487_v46 }
 0x274   :  { %2092 = vmatpush3.bf16.msra.mxu0 %v2401_v51 }
 0x275   :  { %2093 = vmatprep.subr.bf16.mxu0 %v2487_v46 }
 0x278   :  { %2094 = vmatpush3.bf16.msra.mxu0 %v2402_v52 }
 0x279   :  { %2095 = vmatprep.subr.bf16.mxu0 %v2487_v46 }
 0x27c   :  { %2096 = vmatpush3.bf16.msra.mxu0 %v2403_v53 }
 0x332   :  { %v1646_v57 = vpop.f32.mrb[12].mxu0  ;;  %v1687_v58 = vpop.f32.mrb[12].mxu1 }
 0x333   :  { %v1647_v59 = vadd.f32 %v1646_v57, %v1268_v55  ;;  %v1648_v61 = vpop.f32.mrb[13].mxu0  ;;  %v1689_v62 = vpop.f32.mrb[13].mxu1  ;;  %v1688_v6 = vadd.f32 %v1687_v58, %v1276_v60 }
 0x334   :  { %v1649_v63 = vadd.f32 %v1648_v61, %v1272_v56  ;;  %v1650_v0 = vpop.f32.mrb[14].mxu0  ;;  %v1691_v1 = vpop.f32.mrb[14].mxu1  ;;  %v1690_v21 = vadd.f32 %v1689_v62, %v1280_v19 }
 0x335   :  { %v1694_v2 = vmul.f32 0.5, %v1647_v59  ;;  %v1651_v3 = vpop.f32.mrb[15].mxu0  ;;  %v1692_v4 = vpop.f32.mrb[15].mxu1 }
 0x336   :  { %v1698_v5 = vmul.f32 0.5, %v1649_v63  ;;  %v1703_v7 = vmul.f32 0.5, %v1690_v21 }
 0x337   :  { %2424 = vtanh.f32 %v1694_v2 }
 0x338   :  { %2426 = vtanh.f32 %v1698_v5 }
 0x339   :  { %2428 = vtanh.f32 %v1688_v6 }
 0x33a   :  { %2430 = vtanh.f32 %v1703_v7 }
 0x341   :  { %v2425_v8 = vpop.eup %2424 }
 0x342   :  { %v2427_v9 = vpop.eup %2426  ;;  %v1696_v23 = vmul.f32 0.5, %v2425_v8 }
 0x343   :  { %v1700_v10 = vmul.f32 0.5, %v2427_v9  ;;  %v2429_v13 = vpop.eup %2428 }
 0x344   :  { %v1697_v11 = vadd.f32 0.5, %v1696_v23  ;;  %v2431_v37 = vpop.eup %2430 }
 0x345   :  { %v1701_v14 = vadd.f32 0.5, %v1700_v10  ;;  %v1705_v18 = vmul.f32 0.5, %v2431_v37 }
 0x346   :  { %v1708_v15 = vmul.f32 %v2429_v13, %v1697_v11 }
 0x347   :  { %v1707_v16 = vmul.f32 %v1979_v12, %v1701_v14  ;;  %v1706_v20 = vadd.f32 0.5, %v1705_v18 }
 0x349   :  { %v1709_v17 = vadd.f32 %v1708_v15, %v1707_v16 }
 0x34b   :  { %2432 = vtanh.f32 %v1709_v17  ;;  %2048 = vst [vmem:[%s2679_s9 + $0x10] sm:$0xff] %v1709_v17 }
 0x355   :  { %v2433_v22 = vpop.eup %2432 }
 0x356   :  { %v1711_v24 = vmul.f32 %v2433_v22, %v1706_v20 }
 0x358   :  { %2047 = vst [vmem:[%s2678_s8 + $0x10] sm:$0xff] %v1711_v24  ;;  %v1716_v25 = vpack.c.bf16 %v1711_v24, %v1711_v24 }
 0x35a   :  { %2098 = vmatmul.mubr.bf16.vlgmr.msra.gmra.mrb[16].mxu0 %v1716_v25 }
 0x42d   :  { %v1822_v27 = vpop.f32.mrb[16].mxu0 }
 0x42e   :  { %v1823_v28 = vadd.f32 %v2049_v26, %v1822_v27  ;;  %v2099_v29 = vpop.f32.mrb[17].mxu0 }
 0x42f   :  { %v1825_v30 = vpop.f32.mrb[18].mxu0 }
 0x430   :  { %1828 = vst [vmem:[%s2680_s10] sm:$0xff] %v1823_v28  ;;  %v2100_v31 = vpop.f32.mrb[19].mxu0 }
 0x431   :  { %1841 = vsyncpa [#allocation4], 1 }
 0x432   :  { %1842 = vsyncpa [#allocation6], 1 }

</bundles_post_ra>
